<compile_context>
chip_gen: v7x
topology: tpu7x:2x2x1
jax: 0.10.0
libtpu: 0.0.40
codegen_flags: <defaults>
</compile_context>

<pallas_src>
import jax
import jax.numpy as jnp
from jax.experimental import pallas as pl
from jax.experimental.pallas import tpu as pltpu

LANE = 128
VMEM_LIMIT_BYTES = 32 * 1024 * 1024


def _round_up(x, m):
    return ((x + m - 1) // m) * m


def _device_kind():
    try:
        return jax.devices()[0].device_kind.lower()
    except Exception:
        return ""


def _dqn_kernel_mxu(x_ref, w1_ref, w2_ref, b2_ref, w3_ref, b3_ref,
                    w4_ref, b4_ref, out_ref):
    """All four layers on the bf16 MXU with f32 accumulation (v6e/v7x path).

    x_ref is (TM, 8) f32: 4 feature columns, a ones column (so the fc1 bias
    comes out of the matmul for free) and zero padding.  w1_ref is (8, 512)
    bf16 with b1 folded in as row 4.
    """
    x = x_ref[...].astype(jnp.bfloat16)          # tiny (TM, 8) cast
    h1 = jnp.dot(x, w1_ref[...], preferred_element_type=jnp.float32)
    h1 = jnp.maximum(h1, 0.0)

    h2 = jnp.dot(h1.astype(jnp.bfloat16), w2_ref[...],
                 preferred_element_type=jnp.float32) + b2_ref[...]
    h2 = jnp.maximum(h2, 0.0)

    h3 = jnp.dot(h2.astype(jnp.bfloat16), w3_ref[...],
                 preferred_element_type=jnp.float32) + b3_ref[...]
    h3 = jnp.maximum(h3, 0.0)

    h4 = jnp.dot(h3.astype(jnp.bfloat16), w4_ref[...],
                 preferred_element_type=jnp.float32) + b4_ref[...]
    out_ref[...] = h4.astype(out_ref.dtype)


def _dqn_kernel_vpu_fc1(x_ref, w1_ref, b1_ref, w2_ref, b2_ref,
                        w3_ref, b3_ref, w4_ref, b4_ref, out_ref):
    """fc1 (K=4) on the VPU, fc2-fc4 on the bf16 MXU (v5e path: the MXU is the
    binding unit there, so fc1's FMAs are free filler)."""
    x = x_ref[...]                      # (TM, 4)  f32
    w1 = w1_ref[...]                    # (4, 512) f32
    h1 = b1_ref[...]                    # (1, 512) broadcasts over TM rows
    h1 = h1 + x[:, 0:1] * w1[0:1, :]
    h1 = h1 + x[:, 1:2] * w1[1:2, :]
    h1 = h1 + x[:, 2:3] * w1[2:3, :]
    h1 = h1 + x[:, 3:4] * w1[3:4, :]
    h1 = jnp.maximum(h1, 0.0)

    h2 = jnp.dot(h1.astype(jnp.bfloat16), w2_ref[...],
                 preferred_element_type=jnp.float32) + b2_ref[...]
    h2 = jnp.maximum(h2, 0.0)

    h3 = jnp.dot(h2.astype(jnp.bfloat16), w3_ref[...],
                 preferred_element_type=jnp.float32) + b3_ref[...]
    h3 = jnp.maximum(h3, 0.0)

    h4 = jnp.dot(h3.astype(jnp.bfloat16), w4_ref[...],
                 preferred_element_type=jnp.float32) + b4_ref[...]
    out_ref[...] = h4.astype(out_ref.dtype)


def dqn_forward(x, params, *, tm=None):
    """x: (..., 4) float32. Returns (B, num_actions) with B = prod(leading dims)."""
    x2d = x.reshape(-1, 4).astype(jnp.float32)       # == torch x.view(-1, 4)
    B = x2d.shape[0]
    w1, b1, w2, b2, w3, b3, w4, b4 = params
    num_actions = w4.shape[1]

    kind = _device_kind()
    # v5e: 197 TF/s MXU is the bottleneck -> keep K=4 fc1 on the VPU.
    # v6e/v7x (and unknown/default): VPU/XLU saturates first -> fc1 on the MXU.
    vpu_fc1 = ("v5e" in kind) or ("v5 lite" in kind) or ("v5lite" in kind)
    if tm is None:
        tm = 2048 if (("v6" in kind) or ("v7" in kind)) else 1024

    # Lane-dense output: pad fc4 columns to a multiple of 128 with zeros.
    n_pad = _round_up(max(num_actions, LANE), LANE)
    w4p = jnp.zeros((w4.shape[0], n_pad), jnp.float32).at[:, :num_actions].set(w4)
    b4p = jnp.zeros((1, n_pad), jnp.float32).at[:, :num_actions].set(b4)

    # Cast MXU weights to bf16 once, outside the grid (f32 accumulation in-kernel).
    w2b = w2.astype(jnp.bfloat16)
    w3b = w3.astype(jnp.bfloat16)
    w4b = w4p.astype(jnp.bfloat16)

    # Batch tiling: multiple of 8 sublanes, capped at tm, and split into >= 2
    # grid steps whenever the batch allows so the "parallel" batch axis can be
    # sharded across both TensorCores (v7x/megacore). Extra step is noise on
    # single-TC chips.
    b_pad8 = _round_up(max(B, 8), 8)
    tm = max(8, min(tm, b_pad8))
    n_steps = -(-b_pad8 // tm)
    if n_steps == 1 and b_pad8 >= 16:
        n_steps = 2
    tm = _round_up(-(-b_pad8 // n_steps), 8)
    B_pad = tm * n_steps

    if vpu_fc1:
        x_in = x2d
        if B_pad != B:
            x_in = jnp.pad(x_in, ((0, B_pad - B), (0, 0)))
        kernel = _dqn_kernel_vpu_fc1
        x_block = (tm, 4)
        w_shapes = [(4, 512), (1, 512), (512, 512), (1, 512),
                    (512, 128), (1, 128), (128, n_pad), (1, n_pad)]
        args = (x_in, w1, b1, w2b, b2, w3b, b3, w4b, b4p)
    else:
        # Augment x with a ones column and zero-pad K to 8 so fc1 is a single
        # bf16 MXU matmul; fold b1 into row 4 of the padded weight.
        K_PAD = 8
        x_in = jnp.concatenate(
            [x2d, jnp.ones((B, 1), jnp.float32),
             jnp.zeros((B, K_PAD - 5), jnp.float32)], axis=1)
        if B_pad != B:
            x_in = jnp.pad(x_in, ((0, B_pad - B), (0, 0)))
        w1p = (jnp.zeros((K_PAD, 512), jnp.float32)
               .at[:4, :].set(w1)
               .at[4, :].set(b1.reshape(-1))).astype(jnp.bfloat16)
        kernel = _dqn_kernel_mxu
        x_block = (tm, K_PAD)
        w_shapes = [(K_PAD, 512), (512, 512), (1, 512),
                    (512, 128), (1, 128), (128, n_pad), (1, n_pad)]
        args = (x_in, w1p, w2b, b2, w3b, b3, w4b, b4p)

    def _call(single_buffer_weights):
        def w_spec(shape):
            # Weights/biases never change across grid steps (constant index
            # map); single-buffer them to reclaim VMEM for the batch tile.
            if single_buffer_weights:
                return pl.BlockSpec(shape, lambda i: (0, 0),
                                    pipeline_mode=pl.Buffered(1))
            return pl.BlockSpec(shape, lambda i: (0, 0))

        in_specs = [pl.BlockSpec(x_block, lambda i: (i, 0))]
        in_specs += [w_spec(s) for s in w_shapes]
        out_spec = pl.BlockSpec((tm, n_pad), lambda i: (i, 0))

        return pl.pallas_call(
            kernel,
            out_shape=jax.ShapeDtypeStruct((B_pad, n_pad), jnp.float32),
            grid=(B_pad // tm,),
            in_specs=in_specs,
            out_specs=out_spec,
            compiler_params=pltpu.CompilerParams(
                dimension_semantics=("parallel",),
                vmem_limit_bytes=VMEM_LIMIT_BYTES),
        )(*args)

    try:
        out = _call(True)
    except Exception:
        # Single-buffered pipeline_mode unsupported on this jax/libtpu combo:
        # fall back to default double-buffered constant weights.
        out = _call(False)

    # NOTE: for pure action selection, fuse the argmax over the first
    # `num_actions` lanes into the consumer instead of materializing the
    # padded slab; dense f32 Q-values are returned to match the torch forward.
    return out[:B, :num_actions]


def init_params(key, input_dim=4, num_actions=4):
    """Deterministic init mimicking nn.Linear's U(-1/sqrt(fan_in), 1/sqrt(fan_in)).

    Weights stored as (in_features, out_features); biases as (1, out_features)."""
    dims = [(input_dim, 512), (512, 512), (512, 128), (128, num_actions)]
    params = []
    for (fan_in, fan_out) in dims:
        key, kw, kb = jax.random.split(key, 3)
        bound = 1.0 / (fan_in ** 0.5)
        w = jax.random.uniform(kw, (fan_in, fan_out), jnp.float32, -bound, bound)
        b = jax.random.uniform(kb, (1, fan_out), jnp.float32, -bound, bound)
        params += [w, b]
    return tuple(params)


if __name__ == "__main__":
    key = jax.random.PRNGKey(0)
    k_in, k_p = jax.random.split(key)

    B = 8
    num_actions = 4
    x = jax.random.normal(k_in, (B, 4), dtype=jnp.float32)
    params = init_params(k_p, input_dim=4, num_actions=num_actions)

    out = dqn_forward(x, params)
    out = jax.block_until_ready(out)

    # Pure-JAX f32 reference of the same math. The kernel runs fc1-fc4 on the
    # MXU in bf16 with f32 accumulation (fc1 stays f32/VPU on v5e), so the
    # tolerance is relaxed accordingly.
    w1, b1, w2, b2, w3, b3, w4, b4 = params
    h = jnp.maximum(x @ w1 + b1, 0.0)
    h = jnp.maximum(h @ w2 + b2, 0.0)
    h = jnp.maximum(h @ w3 + b3, 0.0)
    ref = h @ w4 + b4

    assert out.shape == (B, num_actions)
    assert jnp.allclose(out, ref, atol=4e-2, rtol=4e-2), (
        float(jnp.max(jnp.abs(out - ref))))

    print("KERNEL_OK")
</pallas_src>

<mosaic_0001>
module attributes {stable_mosaic.version = 11 : i64} {
  func.func @_dqn_kernel_mxu(%arg0: i32, %arg1: memref<8x8xf32, #tpu.memory_space<vmem>>, %arg2: memref<8x512xbf16, #tpu.memory_space<vmem>>, %arg3: memref<512x512xbf16, #tpu.memory_space<vmem>>, %arg4: memref<1x512xf32, #tpu.memory_space<vmem>>, %arg5: memref<512x128xbf16, #tpu.memory_space<vmem>>, %arg6: memref<1x128xf32, #tpu.memory_space<vmem>>, %arg7: memref<128x128xbf16, #tpu.memory_space<vmem>>, %arg8: memref<1x128xf32, #tpu.memory_space<vmem>>, %arg9: memref<8x128xf32, #tpu.memory_space<vmem>>) attributes {dimension_semantics = [#tpu.dimension_semantics<parallel>], iteration_bounds = array<i64: 1>, scalar_prefetch = 0 : i64, scratch_operands = 0 : i64, tpu.core_type = #tpu.core_type<tc>, window_params = [{transform_indices = @transform_0, window_bounds = array<i64: 8, 8>}, {pipeline_mode = #tpu.pipeline_mode<synchronous>, transform_indices = @transform_1, window_bounds = array<i64: 8, 512>}, {pipeline_mode = #tpu.pipeline_mode<synchronous>, transform_indices = @transform_2, window_bounds = array<i64: 512, 512>}, {pipeline_mode = #tpu.pipeline_mode<synchronous>, transform_indices = @transform_3, window_bounds = array<i64: 1, 512>}, {pipeline_mode = #tpu.pipeline_mode<synchronous>, transform_indices = @transform_4, window_bounds = array<i64: 512, 128>}, {pipeline_mode = #tpu.pipeline_mode<synchronous>, transform_indices = @transform_5, window_bounds = array<i64: 1, 128>}, {pipeline_mode = #tpu.pipeline_mode<synchronous>, transform_indices = @transform_6, window_bounds = array<i64: 128, 128>}, {pipeline_mode = #tpu.pipeline_mode<synchronous>, transform_indices = @transform_7, window_bounds = array<i64: 1, 128>}, {transform_indices = @transform_8, window_bounds = array<i64: 8, 128>}]} {
    %c0 = arith.constant 0 : index
    %c0_0 = arith.constant 0 : index
    %0 = vector.load %arg1[%c0, %c0_0] : memref<8x8xf32, #tpu.memory_space<vmem>>, vector<8x8xf32>
    %1 = arith.truncf %0 : vector<8x8xf32> to vector<8x8xbf16>
    %c0_1 = arith.constant 0 : index
    %c0_2 = arith.constant 0 : index
    %2 = vector.load %arg2[%c0_1, %c0_2] : memref<8x512xbf16, #tpu.memory_space<vmem>>, vector<8x512xbf16>
    %cst = arith.constant dense<0.000000e+00> : vector<8x512xf32>
    %3 = tpu.matmul %1, %2, %cst {dimension_numbers = #tpu.dot_dimension_numbers<[1], [0], [0], [1], [0, 0, 1, 1], [], []>} : vector<8x8xbf16>, vector<8x512xbf16>, vector<8x512xf32> -> vector<8x512xf32>
    %cst_3 = arith.constant 0.000000e+00 : f32
    %4 = vector.broadcast %cst_3 : f32 to vector<8x512xf32>
    %5 = arith.maximumf %3, %4 : vector<8x512xf32>
    %6 = arith.truncf %5 : vector<8x512xf32> to vector<8x512xbf16>
    %c0_4 = arith.constant 0 : index
    %c0_5 = arith.constant 0 : index
    %7 = vector.load %arg3[%c0_4, %c0_5] : memref<512x512xbf16, #tpu.memory_space<vmem>>, vector<512x512xbf16>
    %cst_6 = arith.constant dense<0.000000e+00> : vector<8x512xf32>
    %8 = tpu.matmul %6, %7, %cst_6 {dimension_numbers = #tpu.dot_dimension_numbers<[1], [0], [0], [1], [0, 0, 1, 1], [], []>} : vector<8x512xbf16>, vector<512x512xbf16>, vector<8x512xf32> -> vector<8x512xf32>
    %c0_7 = arith.constant 0 : index
    %c0_8 = arith.constant 0 : index
    %9 = vector.load %arg4[%c0_7, %c0_8] : memref<1x512xf32, #tpu.memory_space<vmem>>, vector<1x512xf32>
    %10 = vector.broadcast %9 : vector<1x512xf32> to vector<8x512xf32>
    %11 = arith.addf %8, %10 : vector<8x512xf32>
    %cst_9 = arith.constant 0.000000e+00 : f32
    %12 = vector.broadcast %cst_9 : f32 to vector<8x512xf32>
    %13 = arith.maximumf %11, %12 : vector<8x512xf32>
    %14 = arith.truncf %13 : vector<8x512xf32> to vector<8x512xbf16>
    %c0_10 = arith.constant 0 : index
    %c0_11 = arith.constant 0 : index
    %15 = vector.load %arg5[%c0_10, %c0_11] : memref<512x128xbf16, #tpu.memory_space<vmem>>, vector<512x128xbf16>
    %cst_12 = arith.constant dense<0.000000e+00> : vector<8x128xf32>
    %16 = tpu.matmul %14, %15, %cst_12 {dimension_numbers = #tpu.dot_dimension_numbers<[1], [0], [0], [1], [0, 0, 1, 1], [], []>} : vector<8x512xbf16>, vector<512x128xbf16>, vector<8x128xf32> -> vector<8x128xf32>
    %c0_13 = arith.constant 0 : index
    %c0_14 = arith.constant 0 : index
    %17 = vector.load %arg6[%c0_13, %c0_14] : memref<1x128xf32, #tpu.memory_space<vmem>>, vector<1x128xf32>
    %18 = vector.broadcast %17 : vector<1x128xf32> to vector<8x128xf32>
    %19 = arith.addf %16, %18 : vector<8x128xf32>
    %cst_15 = arith.constant 0.000000e+00 : f32
    %20 = vector.broadcast %cst_15 : f32 to vector<8x128xf32>
    %21 = arith.maximumf %19, %20 : vector<8x128xf32>
    %22 = arith.truncf %21 : vector<8x128xf32> to vector<8x128xbf16>
    %c0_16 = arith.constant 0 : index
    %c0_17 = arith.constant 0 : index
    %23 = vector.load %arg7[%c0_16, %c0_17] : memref<128x128xbf16, #tpu.memory_space<vmem>>, vector<128x128xbf16>
    %cst_18 = arith.constant dense<0.000000e+00> : vector<8x128xf32>
    %24 = tpu.matmul %22, %23, %cst_18 {dimension_numbers = #tpu.dot_dimension_numbers<[1], [0], [0], [1], [0, 0, 1, 1], [], []>} : vector<8x128xbf16>, vector<128x128xbf16>, vector<8x128xf32> -> vector<8x128xf32>
    %c0_19 = arith.constant 0 : index
    %c0_20 = arith.constant 0 : index
    %25 = vector.load %arg8[%c0_19, %c0_20] : memref<1x128xf32, #tpu.memory_space<vmem>>, vector<1x128xf32>
    %26 = vector.broadcast %25 : vector<1x128xf32> to vector<8x128xf32>
    %27 = arith.addf %24, %26 : vector<8x128xf32>
    %c0_21 = arith.constant 0 : index
    %c0_22 = arith.constant 0 : index
    %28 = vector.load %arg9[%c0_21, %c0_22] : memref<8x128xf32, #tpu.memory_space<vmem>>, vector<8x128xf32>
    tpu.vector_store %arg9[%c0_21, %c0_22], %27 {strides = array<i32>} : memref<8x128xf32, #tpu.memory_space<vmem>>, vector<8x128xf32>,
    return
  }
  func.func @transform_0(%arg0: i32) -> (i32, i32) {
    %c0_i32 = arith.constant 0 : i32
    %c0_i32_0 = arith.constant 0 : i32
    return %arg0, %c0_i32 : i32, i32
  }
  func.func @transform_1(%arg0: i32) -> (i32, i32) {
    %c0_i32 = arith.constant 0 : i32
    %c0_i32_0 = arith.constant 0 : i32
    %c0_i32_1 = arith.constant 0 : i32
    return %c0_i32, %c0_i32_0 : i32, i32
  }
  func.func @transform_2(%arg0: i32) -> (i32, i32) {
    %c0_i32 = arith.constant 0 : i32
    %c0_i32_0 = arith.constant 0 : i32
    %c0_i32_1 = arith.constant 0 : i32
    return %c0_i32, %c0_i32_0 : i32, i32
  }
  func.func @transform_3(%arg0: i32) -> (i32, i32) {
    %c0_i32 = arith.constant 0 : i32
    %c0_i32_0 = arith.constant 0 : i32
    %c0_i32_1 = arith.constant 0 : i32
    return %c0_i32, %c0_i32_0 : i32, i32
  }
  func.func @transform_4(%arg0: i32) -> (i32, i32) {
    %c0_i32 = arith.constant 0 : i32
    %c0_i32_0 = arith.constant 0 : i32
    %c0_i32_1 = arith.constant 0 : i32
    return %c0_i32, %c0_i32_0 : i32, i32
  }
  func.func @transform_5(%arg0: i32) -> (i32, i32) {
    %c0_i32 = arith.constant 0 : i32
    %c0_i32_0 = arith.constant 0 : i32
    %c0_i32_1 = arith.constant 0 : i32
    return %c0_i32, %c0_i32_0 : i32, i32
  }
  func.func @transform_6(%arg0: i32) -> (i32, i32) {
    %c0_i32 = arith.constant 0 : i32
    %c0_i32_0 = arith.constant 0 : i32
    %c0_i32_1 = arith.constant 0 : i32
    return %c0_i32, %c0_i32_0 : i32, i32
  }
  func.func @transform_7(%arg0: i32) -> (i32, i32) {
    %c0_i32 = arith.constant 0 : i32
    %c0_i32_0 = arith.constant 0 : i32
    %c0_i32_1 = arith.constant 0 : i32
    return %c0_i32, %c0_i32_0 : i32, i32
  }
  func.func @transform_8(%arg0: i32) -> (i32, i32) {
    %c0_i32 = arith.constant 0 : i32
    %c0_i32_0 = arith.constant 0 : i32
    return %arg0, %c0_i32 : i32, i32
  }
}

module attributes {stable_mosaic.version = 11 : i64} {
  func.func @_dqn_kernel_mxu(%arg0: i32, %arg1: memref<8x8xf32, #tpu.memory_space<vmem>>, %arg2: memref<8x512xbf16, #tpu.memory_space<vmem>>, %arg3: memref<512x512xbf16, #tpu.memory_space<vmem>>, %arg4: memref<1x512xf32, #tpu.memory_space<vmem>>, %arg5: memref<512x128xbf16, #tpu.memory_space<vmem>>, %arg6: memref<1x128xf32, #tpu.memory_space<vmem>>, %arg7: memref<128x128xbf16, #tpu.memory_space<vmem>>, %arg8: memref<1x128xf32, #tpu.memory_space<vmem>>, %arg9: memref<8x128xf32, #tpu.memory_space<vmem>>) attributes {dimension_semantics = [#tpu.dimension_semantics<parallel>], iteration_bounds = array<i64: 1>, scalar_prefetch = 0 : i64, scratch_operands = 0 : i64, tpu.core_type = #tpu.core_type<tc>, window_params = [{transform_indices = @transform_0, window_bounds = array<i64: 8, 8>}, {pipeline_mode = #tpu.pipeline_mode<synchronous>, transform_indices = @transform_1, window_bounds = array<i64: 8, 512>}, {pipeline_mode = #tpu.pipeline_mode<synchronous>, transform_indices = @transform_2, window_bounds = array<i64: 512, 512>}, {pipeline_mode = #tpu.pipeline_mode<synchronous>, transform_indices = @transform_3, window_bounds = array<i64: 1, 512>}, {pipeline_mode = #tpu.pipeline_mode<synchronous>, transform_indices = @transform_4, window_bounds = array<i64: 512, 128>}, {pipeline_mode = #tpu.pipeline_mode<synchronous>, transform_indices = @transform_5, window_bounds = array<i64: 1, 128>}, {pipeline_mode = #tpu.pipeline_mode<synchronous>, transform_indices = @transform_6, window_bounds = array<i64: 128, 128>}, {pipeline_mode = #tpu.pipeline_mode<synchronous>, transform_indices = @transform_7, window_bounds = array<i64: 1, 128>}, {transform_indices = @transform_8, window_bounds = array<i64: 8, 128>}]} {
    %c0 = arith.constant 0 : index
    %c0_0 = arith.constant 0 : index
    %0 = vector.load %arg1[%c0, %c0_0] : memref<8x8xf32, #tpu.memory_space<vmem>>, vector<8x8xf32>
    %1 = arith.truncf %0 : vector<8x8xf32> to vector<8x8xbf16>
    %c0_1 = arith.constant 0 : index
    %c0_2 = arith.constant 0 : index
    %2 = vector.load %arg2[%c0_1, %c0_2] : memref<8x512xbf16, #tpu.memory_space<vmem>>, vector<8x512xbf16>
    %cst = arith.constant dense<0.000000e+00> : vector<8x512xf32>
    %3 = tpu.matmul %1, %2, %cst {dimension_numbers = #tpu.dot_dimension_numbers<[1], [0], [0], [1], [0, 0, 1, 1], [], []>} : vector<8x8xbf16>, vector<8x512xbf16>, vector<8x512xf32> -> vector<8x512xf32>
    %cst_3 = arith.constant 0.000000e+00 : f32
    %4 = vector.broadcast %cst_3 : f32 to vector<8x512xf32>
    %5 = arith.maximumf %3, %4 : vector<8x512xf32>
    %6 = arith.truncf %5 : vector<8x512xf32> to vector<8x512xbf16>
    %c0_4 = arith.constant 0 : index
    %c0_5 = arith.constant 0 : index
    %7 = vector.load %arg3[%c0_4, %c0_5] : memref<512x512xbf16, #tpu.memory_space<vmem>>, vector<512x512xbf16>
    %cst_6 = arith.constant dense<0.000000e+00> : vector<8x512xf32>
    %8 = tpu.matmul %6, %7, %cst_6 {dimension_numbers = #tpu.dot_dimension_numbers<[1], [0], [0], [1], [0, 0, 1, 1], [], []>} : vector<8x512xbf16>, vector<512x512xbf16>, vector<8x512xf32> -> vector<8x512xf32>
    %c0_7 = arith.constant 0 : index
    %c0_8 = arith.constant 0 : index
    %9 = vector.load %arg4[%c0_7, %c0_8] : memref<1x512xf32, #tpu.memory_space<vmem>>, vector<1x512xf32>
    %10 = vector.broadcast %9 : vector<1x512xf32> to vector<8x512xf32>
    %11 = arith.addf %8, %10 : vector<8x512xf32>
    %cst_9 = arith.constant 0.000000e+00 : f32
    %12 = vector.broadcast %cst_9 : f32 to vector<8x512xf32>
    %13 = arith.maximumf %11, %12 : vector<8x512xf32>
    %14 = arith.truncf %13 : vector<8x512xf32> to vector<8x512xbf16>
    %c0_10 = arith.constant 0 : index
    %c0_11 = arith.constant 0 : index
    %15 = vector.load %arg5[%c0_10, %c0_11] : memref<512x128xbf16, #tpu.memory_space<vmem>>, vector<512x128xbf16>
    %cst_12 = arith.constant dense<0.000000e+00> : vector<8x128xf32>
    %16 = tpu.matmul %14, %15, %cst_12 {dimension_numbers = #tpu.dot_dimension_numbers<[1], [0], [0], [1], [0, 0, 1, 1], [], []>} : vector<8x512xbf16>, vector<512x128xbf16>, vector<8x128xf32> -> vector<8x128xf32>
    %c0_13 = arith.constant 0 : index
    %c0_14 = arith.constant 0 : index
    %17 = vector.load %arg6[%c0_13, %c0_14] : memref<1x128xf32, #tpu.memory_space<vmem>>, vector<1x128xf32>
    %18 = vector.broadcast %17 : vector<1x128xf32> to vector<8x128xf32>
    %19 = arith.addf %16, %18 : vector<8x128xf32>
    %cst_15 = arith.constant 0.000000e+00 : f32
    %20 = vector.broadcast %cst_15 : f32 to vector<8x128xf32>
    %21 = arith.maximumf %19, %20 : vector<8x128xf32>
    %22 = arith.truncf %21 : vector<8x128xf32> to vector<8x128xbf16>
    %c0_16 = arith.constant 0 : index
    %c0_17 = arith.constant 0 : index
    %23 = vector.load %arg7[%c0_16, %c0_17] : memref<128x128xbf16, #tpu.memory_space<vmem>>, vector<128x128xbf16>
    %cst_18 = arith.constant dense<0.000000e+00> : vector<8x128xf32>
    %24 = tpu.matmul %22, %23, %cst_18 {dimension_numbers = #tpu.dot_dimension_numbers<[1], [0], [0], [1], [0, 0, 1, 1], [], []>} : vector<8x128xbf16>, vector<128x128xbf16>, vector<8x128xf32> -> vector<8x128xf32>
    %c0_19 = arith.constant 0 : index
    %c0_20 = arith.constant 0 : index
    %25 = vector.load %arg8[%c0_19, %c0_20] : memref<1x128xf32, #tpu.memory_space<vmem>>, vector<1x128xf32>
    %26 = vector.broadcast %25 : vector<1x128xf32> to vector<8x128xf32>
    %27 = arith.addf %24, %26 : vector<8x128xf32>
    %c0_21 = arith.constant 0 : index
    %c0_22 = arith.constant 0 : index
    %28 = vector.load %arg9[%c0_21, %c0_22] : memref<8x128xf32, #tpu.memory_space<vmem>>, vector<8x128xf32>
    tpu.vector_store %arg9[%c0_21, %c0_22], %27 {strides = array<i32>} : memref<8x128xf32, #tpu.memory_space<vmem>>, vector<8x128xf32>,
    return
  }
  func.func @transform_0(%arg0: i32) -> (i32, i32) {
    %c0_i32 = arith.constant 0 : i32
    %c0_i32_0 = arith.constant 0 : i32
    return %arg0, %c0_i32 : i32, i32
  }
  func.func @transform_1(%arg0: i32) -> (i32, i32) {
    %c0_i32 = arith.constant 0 : i32
    %c0_i32_0 = arith.constant 0 : i32
    %c0_i32_1 = arith.constant 0 : i32
    return %c0_i32, %c0_i32_0 : i32, i32
  }
  func.func @transform_2(%arg0: i32) -> (i32, i32) {
    %c0_i32 = arith.constant 0 : i32
    %c0_i32_0 = arith.constant 0 : i32
    %c0_i32_1 = arith.constant 0 : i32
    return %c0_i32, %c0_i32_0 : i32, i32
  }
  func.func @transform_3(%arg0: i32) -> (i32, i32) {
    %c0_i32 = arith.constant 0 : i32
    %c0_i32_0 = arith.constant 0 : i32
    %c0_i32_1 = arith.constant 0 : i32
    return %c0_i32, %c0_i32_0 : i32, i32
  }
  func.func @transform_4(%arg0: i32) -> (i32, i32) {
    %c0_i32 = arith.constant 0 : i32
    %c0_i32_0 = arith.constant 0 : i32
    %c0_i32_1 = arith.constant 0 : i32
    return %c0_i32, %c0_i32_0 : i32, i32
  }
  func.func @transform_5(%arg0: i32) -> (i32, i32) {
    %c0_i32 = arith.constant 0 : i32
    %c0_i32_0 = arith.constant 0 : i32
    %c0_i32_1 = arith.constant 0 : i32
    return %c0_i32, %c0_i32_0 : i32, i32
  }
  func.func @transform_6(%arg0: i32) -> (i32, i32) {
    %c0_i32 = arith.constant 0 : i32
    %c0_i32_0 = arith.constant 0 : i32
    %c0_i32_1 = arith.constant 0 : i32
    return %c0_i32, %c0_i32_0 : i32, i32
  }
  func.func @transform_7(%arg0: i32) -> (i32, i32) {
    %c0_i32 = arith.constant 0 : i32
    %c0_i32_0 = arith.constant 0 : i32
    %c0_i32_1 = arith.constant 0 : i32
    return %c0_i32, %c0_i32_0 : i32, i32
  }
  func.func @transform_8(%arg0: i32) -> (i32, i32) {
    %c0_i32 = arith.constant 0 : i32
    %c0_i32_0 = arith.constant 0 : i32
    return %arg0, %c0_i32 : i32, i32
  }
}

</mosaic_0001>

<bundles_post_ra>
// kernel: tpu_custom_call.1
= control target key start
LH: loop header
LB: loop body
LE: loop exit
PB: predicated region body
PF: predicated region fallthrough
CT: control target
= control target key end

     0   :  { %13 = vsyncpa [#allocation3], 0  ;;  %s2472_s0 = inlined_call_operand.hbm [shape: f32[8,8], index: 0, kind: input, shape index: {}]   ;;  %s2473_s1 = inlined_call_operand.hbm [shape: bf16[8,512], index: 1, kind: input, shape index: {}]   ;;  %s2474_s2 = inlined_call_operand.hbm [shape: bf16[512,512], index: 2, kind: input, shape index: {}]   ;;  %s2475_s3 = inlined_call_operand.vmem [shape: f32[1,512], index: 3, kind: input, shape index: {}]   ;;  %s2476_s4 = inlined_call_operand.hbm [shape: bf16[512,128], index: 4, kind: input, shape index: {}]   ;;  %s2477_s5 = inlined_call_operand.vmem [shape: f32[1,128], index: 5, kind: input, shape index: {}]   ;;  %s2478_s6 = inlined_call_operand.hbm [shape: bf16[128,128], index: 6, kind: input, shape index: {}]   ;;  %s2479_s7 = inlined_call_operand.vmem [shape: f32[1,128], index: 7, kind: input, shape index: {}]   ;;  %s2480_s8 = inlined_call_operand.hbm [shape: f32[8,128], index: 8, kind: output, shape index: {}]  }
   0x1   :  { %14 = vsyncpa [#allocation6], 0 }
   0x2   :  { %15 = vsyncpa [#allocation9], 0 }
   0x3   :  { %16 = vsyncpa [#allocation4], 0  ;;  %s2304_s27 = smov [#allocation5]   ;;  %s2305_s29 = smov [#allocation8]  }
   0x4   :  { %s33_s28 = sshll.u32 %s2304_s27, 4  ;;  %s56_s30 = sshll.u32 %s2305_s29, 4  ;;  %s34_s28 = int_to_ptr.vmem [resolvable:$true] %s33_s28  ;;  %s2362_s30 = int_to_ptr.vmem [resolvable:$true] %s56_s30 }
   0x5   :  { %s2164_s11 = scalar_lea.hbm %s2473_s1, 256 }
   0x6   :  { %p2165_p0 = scmp.ne.s32.totalorder %s2473_s1, %s2164_s11  ;;  %p2168_p1 = scmp.lt.u32.totalorder %s2164_s11, %s2473_s1 }
   0x8   :  { %p2170_p2 = pnand %p2168_p1, %p2165_p0 }
   0xa   :  { %2173 = shalt.err (!%p2170_p2)
}
   0xb   :  { %s2174_s16 = scalar_lea.vmem %s34_s28, 256  ;;  %p2179_p4 = scmp.lt.s32.totalorder %s34_s28, %s34_s28 }
   0xc   :  { %p2175_p3 = scmp.ne.s32.totalorder %s34_s28, %s2174_s16  ;;  %p2180_p5 = scmp.lt.s32.totalorder %s2174_s16, %s2174_s16 }
   0xe   :  { %p2181_p6 = por %p2180_p5, %p2179_p4 }
  0x10   :  { %p2182_p7 = pnand %p2181_p6, %p2175_p3 }
  0x12   :  { %2185 = shalt.err (!%p2182_p7)
}
  0x13   :  { %36 = dma.hbm_to_vmem [thread:$0]  %s2473_s1, 256, %s34_s28, [#allocation6]  }
  0x14   :  { %s2186_s21 = scalar_lea.hbm %s2476_s4, 4096 }
  0x15   :  { %p2187_p8 = scmp.ne.s32.totalorder %s2476_s4, %s2186_s21  ;;  %p2190_p9 = scmp.lt.u32.totalorder %s2186_s21, %s2476_s4 }
  0x17   :  { %p2192_p10 = pnand %p2190_p9, %p2187_p8 }
  0x19   :  { %2195 = shalt.err (!%p2192_p10)
}
  0x1a   :  { %s2196_s26 = scalar_lea.vmem %s2362_s30, 4096  ;;  %p2201_p12 = scmp.lt.s32.totalorder %s2362_s30, %s2362_s30 }
  0x1b   :  { %p2197_p11 = scmp.ne.s32.totalorder %s2362_s30, %s2196_s26  ;;  %p2202_p13 = scmp.lt.s32.totalorder %s2196_s26, %s2196_s26 }
  0x1d   :  { %p2203_p0 = por %p2202_p13, %p2201_p12 }
  0x1f   :  { %p2204_p1 = pnand %p2203_p0, %p2197_p11 }
  0x21   :  { %2207 = shalt.err (!%p2204_p1)
}
  0x22   :  { %s2306_s1 = smov 64   ;;  %s2307_s27 = smov 4  }
  0x23   :  { %62 = dma.hbm_to_vmem [thread:$0]  %s2476_s4, 4096, %s2362_s30, [#allocation9], %s2306_s1, %s2306_s1, %s2307_s27  }
  0x24   :  { %s2308_s9 = smov [#allocation2]   ;;  %s2309_s11 = smov [#allocation7]  }
  0x25   :  { %s23_s10 = sshll.u32 %s2308_s9, 4  ;;  %s42_s12 = sshll.u32 %s2309_s11, 4  ;;  %s24_s10 = int_to_ptr.vmem [resolvable:$true] %s23_s10  ;;  %s2396_s12 = int_to_ptr.vmem [resolvable:$true] %s42_s12 }
  0x26   :  { %s2208_s15 = scalar_lea.hbm %s2472_s0, 128 }
  0x27   :  { %p2209_p2 = scmp.ne.s32.totalorder %s2472_s0, %s2208_s15  ;;  %p2212_p3 = scmp.lt.u32.totalorder %s2208_s15, %s2472_s0 }
  0x29   :  { %p2214_p4 = pnand %p2212_p3, %p2209_p2 }
  0x2b   :  { %2217 = shalt.err (!%p2214_p4)
}
  0x2c   :  { %s2218_s4 = scalar_lea.vmem %s24_s10, 128  ;;  %p2223_p6 = scmp.lt.s32.totalorder %s24_s10, %s24_s10 }
  0x2d   :  { %p2219_p5 = scmp.ne.s32.totalorder %s24_s10, %s2218_s4  ;;  %p2224_p7 = scmp.lt.s32.totalorder %s2218_s4, %s2218_s4 }
  0x2f   :  { %p2225_p8 = por %p2224_p7, %p2223_p6 }
  0x31   :  { %p2226_p9 = pnand %p2225_p8, %p2219_p5 }
  0x33   :  { %2229 = shalt.err (!%p2226_p9)
}
  0x34   :  { %26 = dma.hbm_to_vmem [thread:$0]  %s2472_s0, 128, %s24_s10, [#allocation3]  }
  0x35   :  { %s2230_s23 = scalar_lea.hbm %s2474_s2, 16384 }
  0x36   :  { %p2231_p10 = scmp.ne.s32.totalorder %s2474_s2, %s2230_s23  ;;  %p2234_p11 = scmp.lt.u32.totalorder %s2230_s23, %s2474_s2 }
  0x38   :  { %p2236_p12 = pnand %p2234_p11, %p2231_p10 }
  0x3a   :  { %2239 = shalt.err (!%p2236_p12)
}
  0x3b   :  { %s2240_s29 = scalar_lea.vmem %s2396_s12, 16384  ;;  %p2245_p0 = scmp.lt.s32.totalorder %s2396_s12, %s2396_s12 }
  0x3c   :  { %p2241_p13 = scmp.ne.s32.totalorder %s2396_s12, %s2240_s29  ;;  %p2246_p1 = scmp.lt.s32.totalorder %s2240_s29, %s2240_s29 }
  0x3e   :  { %p2247_p2 = por %p2246_p1, %p2245_p0 }
  0x40   :  { %p2248_p3 = pnand %p2247_p2, %p2241_p13 }
  0x42   :  { %2251 = shalt.err (!%p2248_p3)
}
  0x43   :  { %s2310_s0 = smov 256   ;;  %s2311_s9 = smov 16  }
  0x44   :  { %48 = dma.hbm_to_vmem [thread:$0]  %s2474_s2, 16384, %s2396_s12, [#allocation6], %s2310_s0, %s2310_s0, %s2311_s9  }
  0x45   :  { %s2312_s13 = smov [#allocation10]   ;;  %s2252_s17 = scalar_lea.hbm %s2478_s6, 1024 }
  0x46   :  { %s70_s14 = sshll.u32 %s2312_s13, 4  ;;  %p2253_p4 = scmp.ne.s32.totalorder %s2478_s6, %s2252_s17  ;;  %s71_s14 = int_to_ptr.vmem [resolvable:$true] %s70_s14 }
  0x47   :  { %p2256_p5 = scmp.lt.u32.totalorder %s2252_s17, %s2478_s6 }
  0x49   :  { %p2258_p6 = pnand %p2256_p5, %p2253_p4 }
  0x4b   :  { %2261 = shalt.err (!%p2258_p6)
}
  0x4c   :  { %s2262_s20 = scalar_lea.vmem %s71_s14, 1024  ;;  %p2267_p8 = scmp.lt.s32.totalorder %s71_s14, %s71_s14 }
  0x4d   :  { %p2263_p7 = scmp.ne.s32.totalorder %s71_s14, %s2262_s20  ;;  %p2268_p9 = scmp.lt.s32.totalorder %s2262_s20, %s2262_s20 }
  0x4f   :  { %p2269_p10 = por %p2268_p9, %p2267_p8 }
  0x51   :  { %p2270_p11 = pnand %p2269_p10, %p2263_p7 }
  0x53   :  { %2273 = shalt.err (!%p2270_p11)
}
  0x54   :  { %76 = dma.hbm_to_vmem [thread:$0]  %s2478_s6, 1024, %s71_s14, [#allocation9], %s2306_s1, %s2306_s1, %s2307_s27  }
  0x55   :  { %2296 = dma.done.wait [#allocation3], 128  }
  0x56   :  { %2297 = vsyncadd [#allocation3], 4294967168 }
  0x57   :  { %2298 = dma.done.wait [#allocation6], 16640  }
  0x58   :  { %2299 = vsyncadd [#allocation6], 4294950656 }
  0x59   :  { %2300 = dma.done.wait [#allocation9], 5120  }
  0x5a   :  { %2301 = vsyncadd [#allocation9], 4294962176  ;;  %v2313_v0 = vmov 0   ;;  %v97_v1 = vld [vmem:[#allocation5] sm:$0xff]  ;;  %vm113_vm0 = vcmask 1043456   ;;  %v95_v2 = vld [vmem:[#allocation2] sm:$0xff] }
  0x5b   :  { %158 = vmatprep.mubr.bf16.mxu1 %v2313_v0  ;;  %v98_v3 = vld [vmem:[#allocation5 + $0x8] sm:$0xff]  ;;  %v1653_v4 = vcombine.high %v97_v1, %v97_v1  ;;  %v1652_v5 = vcombine.low %v97_v1, %v97_v1  ;;  %v1932_v7 = vld [vmem:[#allocation7 + $0x4] ss:$16 sps:$4 sm:$0xff]   ;;  %v96_v10 = vpack.c.bf16 %v95_v2, %v95_v2  ;;  %v1937_v11 = vld [vmem:[#allocation7] ss:$16 sps:$4 sm:$0xff]   ;;  %vm109_vm1 = vcmask 64512  }
  0x5c   :  { %v1655_v6 = vcombine.high %v98_v3, %v98_v3  ;;  %v1654_v8 = vcombine.low %v98_v3, %v98_v3  ;;  %1006 = vmatprep.subr.bf16.mxu0 %v1932_v7  ;;  %v1938_v12 = vld [vmem:[#allocation7 + $0x24] ss:$16 sps:$4 sm:$0xff]   ;;  %v1936_v14 = vld [vmem:[#allocation7 + $0xc] ss:$16 sps:$4 sm:$0xff]   ;;  %v1943_v15 = vld [vmem:[#allocation7 + $0x20] ss:$16 sps:$4 sm:$0xff]  }
  0x5d   :  { %1656 = vmatprep.subr.msk.bf16.mxu1 %vm113_vm0, %v1653_v4  ;;  %v115_v9 = vsel %vm113_vm0, %v1652_v5, 0  ;;  %1007 = vmatpush1.bf16.msra.mxu0 %v1937_v11  ;;  %v1944_v16 = vld [vmem:[#allocation7 + $0x44] ss:$16 sps:$4 sm:$0xff]   ;;  %v1949_v17 = vld [vmem:[#allocation7 + $0x40] ss:$16 sps:$4 sm:$0xff]   ;;  %vm2315_vm2 = vmmov 0  }
  0x5e   :  { %127 = vmatpush1.bf16.msra.mxu1 %v115_v9  ;;  %v121_v13 = vsel %vm113_vm0, %v1654_v8, 0  ;;  %1008 = vmatprep.subr.bf16.mxu0 %v1938_v12  ;;  %v1950_v18 = vld [vmem:[#allocation7 + $0x64] ss:$16 sps:$4 sm:$0xff]   ;;  %v1934_v19 = vld [vmem:[#allocation7 + $0x8] ss:$16 sps:$4 sm:$0xff]   ;;  %s2316_s23 = smov [#allocation11]  }
  0x5f   :  { %1658 = vmatprep.subr.msk.bf16.mxu1 %vm113_vm0, %v1655_v6  ;;  %v1942_v20 = vld [vmem:[#allocation7 + $0x2c] ss:$16 sps:$4 sm:$0xff]   ;;  %v1955_v21 = vld [vmem:[#allocation7 + $0x60] ss:$16 sps:$4 sm:$0xff]   ;;  %v1956_v22 = vld [vmem:[#allocation7 + $0x84] ss:$16 sps:$4 sm:$0xff]  }
  0x60   :  { %v1940_v23 = vld [vmem:[#allocation7 + $0x28] ss:$16 sps:$4 sm:$0xff]   ;;  %v1948_v24 = vld [vmem:[#allocation7 + $0x4c] ss:$16 sps:$4 sm:$0xff]   ;;  %v1961_v25 = vld [vmem:[#allocation7 + $0x80] ss:$16 sps:$4 sm:$0xff]  }
  0x61   :  { %1657 = vmatmul.mubr.msk.bf16.vlgmr.msra.gmra.mrb[0].mxu1 %vm109_vm1, %v96_v10  ;;  %1009 = vmatpush1.bf16.msra.mxu0 %v1943_v15  ;;  %v1962_v26 = vld [vmem:[#allocation7 + $0xa4] ss:$16 sps:$4 sm:$0xff]   ;;  %v1946_v27 = vld [vmem:[#allocation7 + $0x48] ss:$16 sps:$4 sm:$0xff]   ;;  %v1954_v28 = vld [vmem:[#allocation7 + $0x6c] ss:$16 sps:$4 sm:$0xff]  }
  0x62   :  { %168 = vmatpush1.bf16.msra.mxu1 %v121_v13  ;;  %199 = vmatprep.mubr.bf16.mxu1 %v2313_v0  ;;  %v1967_v29 = vld [vmem:[#allocation7 + $0xa0] ss:$16 sps:$4 sm:$0xff]   ;;  %v1968_v30 = vld [vmem:[#allocation7 + $0xc4] ss:$16 sps:$4 sm:$0xff]   ;;  %v1952_v31 = vld [vmem:[#allocation7 + $0x68] ss:$16 sps:$4 sm:$0xff]  }
  0x63   :  { %1088 = vmatprep.subr.bf16.mxu1 %v1936_v14  ;;  %1010 = vmatprep.subr.bf16.mxu0 %v1944_v16  ;;  %v1960_v32 = vld [vmem:[#allocation7 + $0x8c] ss:$16 sps:$4 sm:$0xff]   ;;  %v1973_v33 = vld [vmem:[#allocation7 + $0xc0] ss:$16 sps:$4 sm:$0xff]   ;;  %v1974_v34 = vld [vmem:[#allocation7 + $0xe4] ss:$16 sps:$4 sm:$0xff]  }
  0x64   :  { %v1958_v35 = vld [vmem:[#allocation7 + $0x88] ss:$16 sps:$4 sm:$0xff]   ;;  %v1966_v36 = vld [vmem:[#allocation7 + $0xac] ss:$16 sps:$4 sm:$0xff]   ;;  %v1979_v37 = vld [vmem:[#allocation7 + $0xe0] ss:$16 sps:$4 sm:$0xff]  }
  0x65   :  { %1011 = vmatpush1.bf16.msra.mxu0 %v1949_v17  ;;  %v1980_v38 = vld [vmem:[#allocation7 + $0x104] ss:$16 sps:$4 sm:$0xff]   ;;  %v1964_v39 = vld [vmem:[#allocation7 + $0xa8] ss:$16 sps:$4 sm:$0xff]   ;;  %v1972_v40 = vld [vmem:[#allocation7 + $0xcc] ss:$16 sps:$4 sm:$0xff]  }
  0x66   :  { %1012 = vmatprep.subr.bf16.mxu0 %v1950_v18  ;;  %v1985_v41 = vld [vmem:[#allocation7 + $0x100] ss:$16 sps:$4 sm:$0xff]   ;;  %v1986_v42 = vld [vmem:[#allocation7 + $0x124] ss:$16 sps:$4 sm:$0xff]   ;;  %v1970_v43 = vld [vmem:[#allocation7 + $0xc8] ss:$16 sps:$4 sm:$0xff]  }
  0x67   :  { %v1978_v44 = vld [vmem:[#allocation7 + $0xec] ss:$16 sps:$4 sm:$0xff]   ;;  %v1991_v45 = vld [vmem:[#allocation7 + $0x120] ss:$16 sps:$4 sm:$0xff]   ;;  %v1992_v46 = vld [vmem:[#allocation7 + $0x144] ss:$16 sps:$4 sm:$0xff]  }
  0x68   :  { %v1976_v47 = vld [vmem:[#allocation7 + $0xe8] ss:$16 sps:$4 sm:$0xff]   ;;  %v1984_v48 = vld [vmem:[#allocation7 + $0x10c] ss:$16 sps:$4 sm:$0xff]   ;;  %v1997_v49 = vld [vmem:[#allocation7 + $0x140] ss:$16 sps:$4 sm:$0xff]  }
  0x69   :  { %1659 = vmatmul.mubr.msk.bf16.vlgmr.msra.gmra.mrb[4].mxu1 %vm109_vm1, %v96_v10  ;;  %1013 = vmatpush1.bf16.msra.mxu0 %v1955_v21  ;;  %v1998_v50 = vld [vmem:[#allocation7 + $0x164] ss:$16 sps:$4 sm:$0xff]   ;;  %v1982_v51 = vld [vmem:[#allocation7 + $0x108] ss:$16 sps:$4 sm:$0xff]   ;;  %v1990_v52 = vld [vmem:[#allocation7 + $0x12c] ss:$16 sps:$4 sm:$0xff]  }
  0x6a   :  { %1089 = vmatpush1.bf16.msra.mxu1 %v1934_v19  ;;  %1014 = vmatprep.subr.bf16.mxu0 %v1956_v22  ;;  %v2003_v53 = vld [vmem:[#allocation7 + $0x160] ss:$16 sps:$4 sm:$0xff]   ;;  %v2004_v54 = vld [vmem:[#allocation7 + $0x184] ss:$16 sps:$4 sm:$0xff]   ;;  %v1988_v55 = vld [vmem:[#allocation7 + $0x128] ss:$16 sps:$4 sm:$0xff]  }
  0x6b   :  { %1090 = vmatprep.subr.bf16.mxu1 %v1942_v20  ;;  %v1996_v56 = vld [vmem:[#allocation7 + $0x14c] ss:$16 sps:$4 sm:$0xff]   ;;  %v2009_v57 = vld [vmem:[#allocation7 + $0x180] ss:$16 sps:$4 sm:$0xff]   ;;  %v2010_v58 = vld [vmem:[#allocation7 + $0x1a4] ss:$16 sps:$4 sm:$0xff]  }
  0x6c   :  { %v1994_v59 = vld [vmem:[#allocation7 + $0x148] ss:$16 sps:$4 sm:$0xff]   ;;  %v2002_v60 = vld [vmem:[#allocation7 + $0x16c] ss:$16 sps:$4 sm:$0xff]   ;;  %v2015_v61 = vld [vmem:[#allocation7 + $0x1a0] ss:$16 sps:$4 sm:$0xff]  }
  0x6d   :  { %1015 = vmatpush1.bf16.msra.mxu0 %v1961_v25  ;;  %v2016_v62 = vld [vmem:[#allocation7 + $0x1c4] ss:$16 sps:$4 sm:$0xff]   ;;  %v2000_v63 = vld [vmem:[#allocation7 + $0x168] ss:$16 sps:$4 sm:$0xff]   ;;  %v2008_v0 = vld [vmem:[#allocation7 + $0x18c] ss:$16 sps:$4 sm:$0xff]  }
  0x6e   :  { %1091 = vmatpush1.bf16.msra.mxu1 %v1940_v23  ;;  %1016 = vmatprep.subr.bf16.mxu0 %v1962_v26  ;;  %v2021_v1 = vld [vmem:[#allocation7 + $0x1c0] ss:$16 sps:$4 sm:$0xff]   ;;  %v2006_v2 = vld [vmem:[#allocation7 + $0x188] ss:$16 sps:$4 sm:$0xff]   ;;  %v2014_v3 = vld [vmem:[#allocation7 + $0x1ac] ss:$16 sps:$4 sm:$0xff]  }
  0x6f   :  { %1092 = vmatprep.subr.bf16.mxu1 %v1948_v24  ;;  %v2012_v4 = vld [vmem:[#allocation7 + $0x1a8] ss:$16 sps:$4 sm:$0xff]   ;;  %v2020_v5 = vld [vmem:[#allocation7 + $0x1cc] ss:$16 sps:$4 sm:$0xff]   ;;  %v2022_v7 = vld [vmem:[#allocation7 + $0x1e4] ss:$16 sps:$4 sm:$0xff]  }
  0x70   :  { %v2018_v6 = vld [vmem:[#allocation7 + $0x1c8] ss:$16 sps:$4 sm:$0xff]   ;;  %v2026_v8 = vld [vmem:[#allocation7 + $0x1ec] ss:$16 sps:$4 sm:$0xff]   ;;  %v2027_v10 = vld [vmem:[#allocation7 + $0x1e0] ss:$16 sps:$4 sm:$0xff]  }
  0x71   :  { %1017 = vmatpush1.bf16.msra.mxu0 %v1967_v29  ;;  %v2024_v9 = vld [vmem:[#allocation7 + $0x1e8] ss:$16 sps:$4 sm:$0xff]   ;;  %v2030_v11 = vld [vmem:[#allocation7 + $0x204] ss:$16 sps:$4 sm:$0xff]   ;;  %v2033_v12 = vld [vmem:[#allocation7 + $0x20c] ss:$16 sps:$4 sm:$0xff]  }
  0x72   :  { %1093 = vmatpush1.bf16.msra.mxu1 %v1946_v27  ;;  %1018 = vmatprep.subr.bf16.mxu0 %v1968_v30  ;;  %v2028_v20 = vld [vmem:[#allocation7 + $0x200] ss:$16 sps:$4 sm:$0xff]   ;;  %v2031_v21 = vld [vmem:[#allocation7 + $0x208] ss:$16 sps:$4 sm:$0xff]   ;;  %v2036_v23 = vld [vmem:[#allocation7 + $0x224] ss:$16 sps:$4 sm:$0xff]  }
  0x73   :  { %1094 = vmatprep.subr.bf16.mxu1 %v1954_v28  ;;  %v2039_v24 = vld [vmem:[#allocation7 + $0x22c] ss:$16 sps:$4 sm:$0xff]   ;;  %v2034_v25 = vld [vmem:[#allocation7 + $0x220] ss:$16 sps:$4 sm:$0xff]   ;;  %v2037_v26 = vld [vmem:[#allocation7 + $0x228] ss:$16 sps:$4 sm:$0xff]  }
  0x74   :  { %v2042_v28 = vld [vmem:[#allocation7 + $0x244] ss:$16 sps:$4 sm:$0xff]   ;;  %v2045_v29 = vld [vmem:[#allocation7 + $0x24c] ss:$16 sps:$4 sm:$0xff]   ;;  %s1641_s24 = sshll.u32 %s2316_s23, 4  ;;  %s1642_s24 = int_to_ptr.vmem [resolvable:$true] %s1641_s24 }
  0x75   :  { %1019 = vmatpush1.bf16.msra.mxu0 %v1973_v33  ;;  %p2279_p13 = scmp.lt.s32.totalorder %s1642_s24, %s1642_s24 }
  0x76   :  { %1095 = vmatpush1.bf16.msra.mxu1 %v1952_v31  ;;  %1020 = vmatprep.subr.bf16.mxu0 %v1974_v34  ;;  %v2040_v34 = vld [vmem:[#allocation7 + $0x240] ss:$16 sps:$4 sm:$0xff]  }
  0x77   :  { %1096 = vmatprep.subr.bf16.mxu1 %v1960_v32 }
  0x79   :  { %1021 = vmatpush1.bf16.msra.mxu0 %v1979_v37  ;;  %v2048_v37 = vld [vmem:[#allocation7 + $0x264] ss:$16 sps:$4 sm:$0xff]  }
  0x7a   :  { %1097 = vmatpush1.bf16.msra.mxu1 %v1958_v35  ;;  %1022 = vmatprep.subr.bf16.mxu0 %v1980_v38  ;;  %v2043_v35 = vld [vmem:[#allocation7 + $0x248] ss:$16 sps:$4 sm:$0xff]   ;;  %v2051_v38 = vld [vmem:[#allocation7 + $0x26c] ss:$16 sps:$4 sm:$0xff]  }
  0x7b   :  { %1098 = vmatprep.subr.bf16.mxu1 %v1966_v36 }
  0x7d   :  { %1023 = vmatpush1.bf16.msra.mxu0 %v1985_v41  ;;  %v2054_v41 = vld [vmem:[#allocation7 + $0x284] ss:$16 sps:$4 sm:$0xff]  }
  0x7e   :  { %1099 = vmatpush1.bf16.msra.mxu1 %v1964_v39  ;;  %1024 = vmatprep.subr.bf16.mxu0 %v1986_v42  ;;  %v2046_v39 = vld [vmem:[#allocation7 + $0x260] ss:$16 sps:$4 sm:$0xff]   ;;  %v2057_v42 = vld [vmem:[#allocation7 + $0x28c] ss:$16 sps:$4 sm:$0xff]  }
  0x7f   :  { %1100 = vmatprep.subr.bf16.mxu1 %v1972_v40  ;;  %v2049_v40 = vld [vmem:[#allocation7 + $0x268] ss:$16 sps:$4 sm:$0xff]  }
  0x81   :  { %1025 = vmatpush1.bf16.msra.mxu0 %v1991_v45  ;;  %v2060_v45 = vld [vmem:[#allocation7 + $0x2a4] ss:$16 sps:$4 sm:$0xff]  }
  0x82   :  { %1101 = vmatpush1.bf16.msra.mxu1 %v1970_v43  ;;  %1026 = vmatprep.subr.bf16.mxu0 %v1992_v46  ;;  %v2052_v43 = vld [vmem:[#allocation7 + $0x280] ss:$16 sps:$4 sm:$0xff]   ;;  %v2063_v46 = vld [vmem:[#allocation7 + $0x2ac] ss:$16 sps:$4 sm:$0xff]  }
  0x83   :  { %1102 = vmatprep.subr.bf16.mxu1 %v1978_v44  ;;  %v2055_v44 = vld [vmem:[#allocation7 + $0x288] ss:$16 sps:$4 sm:$0xff]  }
  0x85   :  { %1027 = vmatpush1.bf16.msra.mxu0 %v1997_v49  ;;  %v2066_v49 = vld [vmem:[#allocation7 + $0x2c4] ss:$16 sps:$4 sm:$0xff]  }
  0x86   :  { %1103 = vmatpush1.bf16.msra.mxu1 %v1976_v47  ;;  %1028 = vmatprep.subr.bf16.mxu0 %v1998_v50  ;;  %v2058_v47 = vld [vmem:[#allocation7 + $0x2a0] ss:$16 sps:$4 sm:$0xff]   ;;  %v2069_v50 = vld [vmem:[#allocation7 + $0x2cc] ss:$16 sps:$4 sm:$0xff]  }
  0x87   :  { %1104 = vmatprep.subr.bf16.mxu1 %v1984_v48  ;;  %v2061_v48 = vld [vmem:[#allocation7 + $0x2a8] ss:$16 sps:$4 sm:$0xff]  }
  0x89   :  { %1029 = vmatpush1.bf16.msra.mxu0 %v2003_v53  ;;  %v2072_v53 = vld [vmem:[#allocation7 + $0x2e4] ss:$16 sps:$4 sm:$0xff]  }
  0x8a   :  { %1105 = vmatpush1.bf16.msra.mxu1 %v1982_v51  ;;  %1030 = vmatprep.subr.bf16.mxu0 %v2004_v54  ;;  %v2064_v51 = vld [vmem:[#allocation7 + $0x2c0] ss:$16 sps:$4 sm:$0xff]   ;;  %v2075_v54 = vld [vmem:[#allocation7 + $0x2ec] ss:$16 sps:$4 sm:$0xff]  }
  0x8b   :  { %1106 = vmatprep.subr.bf16.mxu1 %v1990_v52  ;;  %v2067_v52 = vld [vmem:[#allocation7 + $0x2c8] ss:$16 sps:$4 sm:$0xff]  }
  0x8d   :  { %1031 = vmatpush1.bf16.msra.mxu0 %v2009_v57  ;;  %v2078_v57 = vld [vmem:[#allocation7 + $0x304] ss:$16 sps:$4 sm:$0xff]  }
  0x8e   :  { %1107 = vmatpush1.bf16.msra.mxu1 %v1988_v55  ;;  %1032 = vmatprep.subr.bf16.mxu0 %v2010_v58  ;;  %v2070_v55 = vld [vmem:[#allocation7 + $0x2e0] ss:$16 sps:$4 sm:$0xff]   ;;  %v2081_v58 = vld [vmem:[#allocation7 + $0x30c] ss:$16 sps:$4 sm:$0xff]  }
  0x8f   :  { %1108 = vmatprep.subr.bf16.mxu1 %v1996_v56  ;;  %v2073_v56 = vld [vmem:[#allocation7 + $0x2e8] ss:$16 sps:$4 sm:$0xff]  }
  0x91   :  { %1033 = vmatpush1.bf16.msra.mxu0 %v2015_v61  ;;  %v2084_v61 = vld [vmem:[#allocation7 + $0x324] ss:$16 sps:$4 sm:$0xff]  }
  0x92   :  { %1109 = vmatpush1.bf16.msra.mxu1 %v1994_v59  ;;  %1034 = vmatprep.subr.bf16.mxu0 %v2016_v62  ;;  %v2076_v59 = vld [vmem:[#allocation7 + $0x300] ss:$16 sps:$4 sm:$0xff]   ;;  %v2087_v62 = vld [vmem:[#allocation7 + $0x32c] ss:$16 sps:$4 sm:$0xff]  }
  0x93   :  { %1110 = vmatprep.subr.bf16.mxu1 %v2002_v60  ;;  %v2079_v60 = vld [vmem:[#allocation7 + $0x308] ss:$16 sps:$4 sm:$0xff]  }
  0x95   :  { %1035 = vmatpush1.bf16.msra.mxu0 %v2021_v1  ;;  %v2090_v1 = vld [vmem:[#allocation7 + $0x344] ss:$16 sps:$4 sm:$0xff]  }
  0x96   :  { %1111 = vmatpush1.bf16.msra.mxu1 %v2000_v63  ;;  %1036 = vmatprep.subr.bf16.mxu0 %v2022_v7  ;;  %v2082_v63 = vld [vmem:[#allocation7 + $0x320] ss:$16 sps:$4 sm:$0xff]  }
  0x97   :  { %1112 = vmatprep.subr.bf16.mxu1 %v2008_v0  ;;  %v2085_v0 = vld [vmem:[#allocation7 + $0x328] ss:$16 sps:$4 sm:$0xff]   ;;  %v2094_v7 = vld [vmem:[#allocation7 + $0x360] ss:$16 sps:$4 sm:$0xff]  }
  0x99   :  { %1037 = vmatpush1.bf16.msra.mxu0 %v2027_v10  ;;  %v2105_v10 = vld [vmem:[#allocation7 + $0x38c] ss:$16 sps:$4 sm:$0xff]  }
  0x9a   :  { %1113 = vmatpush1.bf16.msra.mxu1 %v2006_v2  ;;  %1047 = vmatprep.subr.bf16.mxu0 %v2030_v11  ;;  %v2093_v2 = vld [vmem:[#allocation7 + $0x34c] ss:$16 sps:$4 sm:$0xff]   ;;  %v2100_v11 = vld [vmem:[#allocation7 + $0x380] ss:$16 sps:$4 sm:$0xff]  }
  0x9b   :  { %1114 = vmatprep.subr.bf16.mxu1 %v2014_v3  ;;  %v2088_v3 = vld [vmem:[#allocation7 + $0x340] ss:$16 sps:$4 sm:$0xff]  }
  0x9e   :  { %1115 = vmatpush1.bf16.msra.mxu1 %v2012_v4  ;;  %v2091_v4 = vld [vmem:[#allocation7 + $0x348] ss:$16 sps:$4 sm:$0xff]  }
  0x9f   :  { %1116 = vmatprep.subr.bf16.mxu1 %v2020_v5  ;;  %v2096_v5 = vld [vmem:[#allocation7 + $0x364] ss:$16 sps:$4 sm:$0xff]  }
  0xa2   :  { %1117 = vmatpush1.bf16.msra.mxu1 %v2018_v6  ;;  %v2099_v6 = vld [vmem:[#allocation7 + $0x36c] ss:$16 sps:$4 sm:$0xff]  }
  0xa3   :  { %1118 = vmatprep.subr.bf16.mxu1 %v2026_v8  ;;  %v2097_v8 = vld [vmem:[#allocation7 + $0x368] ss:$16 sps:$4 sm:$0xff]  }
  0xa6   :  { %1119 = vmatpush1.bf16.msra.mxu1 %v2024_v9  ;;  %v2102_v9 = vld [vmem:[#allocation7 + $0x384] ss:$16 sps:$4 sm:$0xff]  }
  0xa7   :  { %1129 = vmatprep.subr.bf16.mxu1 %v2033_v12  ;;  %v2103_v12 = vld [vmem:[#allocation7 + $0x388] ss:$16 sps:$4 sm:$0xff]  }
 0x134   :  { %v160_v13 = vpop.f32.mrb[0].mxu1 }
 0x135   :  { %v208_v14 = vmax.f32 %v160_v13, 0.0  ;;  %v162_v15 = vpop.f32.mrb[1].mxu1  ;;  %v2108_v13 = vld [vmem:[#allocation7 + $0x3a4] ss:$16 sps:$4 sm:$0xff]  }
 0x136   :  { %v209_v16 = vmax.f32 %v162_v15, 0.0  ;;  %v164_v17 = vpop.f32.mrb[2].mxu1  ;;  %v2106_v15 = vld [vmem:[#allocation7 + $0x3a0] ss:$16 sps:$4 sm:$0xff]  }
 0x137   :  { %v165_v18 = vpop.f32.mrb[3].mxu1  ;;  %v212_v22 = vpack.c.bf16 %v208_v14, %v208_v14  ;;  %v2111_v14 = vld [vmem:[#allocation7 + $0x3ac] ss:$16 sps:$4 sm:$0xff]   ;;  %v2114_v17 = vld [vmem:[#allocation7 + $0x3c4] ss:$16 sps:$4 sm:$0xff]  }
 0x138   :  { %v213_v19 = vpack.c.bf16 %v209_v16, %v209_v16  ;;  %v2109_v16 = vld [vmem:[#allocation7 + $0x3a8] ss:$16 sps:$4 sm:$0xff]   ;;  %v2117_v18 = vld [vmem:[#allocation7 + $0x3cc] ss:$16 sps:$4 sm:$0xff]  }
 0x13a   :  { %1038 = vmatprep.mubr.bf16.mxu0 %v213_v19  ;;  %1120 = vmatprep.mubr.bf16.mxu1 %v213_v19  ;;  %v2112_v19 = vld [vmem:[#allocation7 + $0x3c0] ss:$16 sps:$4 sm:$0xff]  }
 0x13b   :  { %1039 = vmatmul.mubr.bf16.vlgmr.msra.gmra.mrb[0].mxu0 %v212_v22  ;;  %1121 = vmatmul.mubr.bf16.vlgmr.msra.gmra.mrb[8].mxu1 %v212_v22  ;;  %v2123_v22 = vld [vmem:[#allocation7 + $0x3ec] ss:$16 sps:$4 sm:$0xff]  }
 0x13c   :  { %1048 = vmatpush1.bf16.msra.mxu0 %v2028_v20  ;;  %1130 = vmatpush1.bf16.msra.mxu1 %v2031_v21  ;;  %v2448_v27 = vpop.f32.mrb[4].mxu1  ;;  %v2115_v20 = vld [vmem:[#allocation7 + $0x3c8] ss:$16 sps:$4 sm:$0xff]   ;;  %v2120_v21 = vld [vmem:[#allocation7 + $0x3e4] ss:$16 sps:$4 sm:$0xff]  }
 0x13d   :  { %1049 = vmatprep.subr.bf16.mxu0 %v2036_v23  ;;  %1131 = vmatprep.subr.bf16.mxu1 %v2039_v24  ;;  %v203_v30 = vpop.f32.mrb[5].mxu1  ;;  %v2118_v23 = vld [vmem:[#allocation7 + $0x3e0] ss:$16 sps:$4 sm:$0xff]   ;;  %v2121_v24 = vld [vmem:[#allocation7 + $0x3e8] ss:$16 sps:$4 sm:$0xff]  }
 0x13e   :  { %v211_v31 = vmax.f32 %v203_v30, 0.0  ;;  %v205_v32 = vpop.f32.mrb[6].mxu1  ;;  %v2127_v30 = vld [vmem:[#allocation8 + $0x80] sm:$0xff]  }
 0x13f   :  { %v206_v33 = vpop.f32.mrb[7].mxu1  ;;  %v2128_v32 = vld [vmem:[#allocation8 + $0x48] sm:$0xff]  }
 0x140   :  { %1050 = vmatpush1.bf16.msra.mxu0 %v2034_v25  ;;  %1132 = vmatpush1.bf16.msra.mxu1 %v2037_v26  ;;  %v215_v36 = vpack.c.bf16 %v211_v31, %v211_v31  ;;  %v210_v25 = vmax.f32 %v2448_v27, 0.0  ;;  %v2124_v26 = vld [vmem:[#allocation8 + $0x40] sm:$0xff]   ;;  %v2129_v33 = vld [vmem:[#allocation8 + $0xc8] sm:$0xff]   ;;  %v2132_v27 = vld [vmem:[#allocation8 + $0x50] sm:$0xff]  }
 0x141   :  { %1051 = vmatprep.subr.bf16.mxu0 %v2042_v28  ;;  %1133 = vmatprep.subr.bf16.mxu1 %v2045_v29  ;;  %v2125_v28 = vld [vmem:[#allocation8 + $0xc0] sm:$0xff]  }
 0x142   :  { %1079 = vmatprep.mubr.bf16.mxu0 %v215_v36  ;;  %1161 = vmatprep.mubr.bf16.mxu1 %v215_v36  ;;  %v2126_v29 = vld [vmem:[#allocation8] sm:$0xff]   ;;  %v214_v31 = vpack.c.bf16 %v210_v25, %v210_v25  ;;  %v2133_v36 = vld [vmem:[#allocation8 + $0xd0] sm:$0xff]  }
 0x143   :  { %v2156_v25 = vld [vmem:[#allocation10] sm:$0xff]  }
 0x144   :  { %1052 = vmatpush1.bf16.msra.mxu0 %v2040_v34  ;;  %1134 = vmatpush1.bf16.msra.mxu1 %v2043_v35  ;;  %v2130_v34 = vld [vmem:[#allocation8 + $0x8] sm:$0xff]  }
 0x145   :  { %1053 = vmatprep.subr.bf16.mxu0 %v2048_v37  ;;  %1135 = vmatprep.subr.bf16.mxu1 %v2051_v38  ;;  %v2131_v35 = vld [vmem:[#allocation8 + $0x88] sm:$0xff]   ;;  %v2134_v37 = vld [vmem:[#allocation8 + $0x10] sm:$0xff]  }
 0x146   :  { %v2135_v38 = vld [vmem:[#allocation8 + $0x90] sm:$0xff]  }
 0x148   :  { %1054 = vmatpush1.bf16.msra.mxu0 %v2046_v39  ;;  %1136 = vmatpush1.bf16.msra.mxu1 %v2049_v40  ;;  %v2136_v39 = vld [vmem:[#allocation8 + $0x58] sm:$0xff]  }
 0x149   :  { %1055 = vmatprep.subr.bf16.mxu0 %v2054_v41  ;;  %1137 = vmatprep.subr.bf16.mxu1 %v2057_v42  ;;  %v2137_v40 = vld [vmem:[#allocation8 + $0xd8] sm:$0xff]  }
 0x14a   :  { %v2138_v41 = vld [vmem:[#allocation8 + $0x18] sm:$0xff]  }
 0x14b   :  { %v2139_v42 = vld [vmem:[#allocation8 + $0x98] sm:$0xff]  }
 0x14c   :  { %1056 = vmatpush1.bf16.msra.mxu0 %v2052_v43  ;;  %1138 = vmatpush1.bf16.msra.mxu1 %v2055_v44  ;;  %v2140_v43 = vld [vmem:[#allocation8 + $0x60] sm:$0xff]  }
 0x14d   :  { %1057 = vmatprep.subr.bf16.mxu0 %v2060_v45  ;;  %1139 = vmatprep.subr.bf16.mxu1 %v2063_v46  ;;  %v2141_v44 = vld [vmem:[#allocation8 + $0xe0] sm:$0xff]  }
 0x14e   :  { %v2142_v45 = vld [vmem:[#allocation8 + $0x20] sm:$0xff]  }
 0x14f   :  { %v2143_v46 = vld [vmem:[#allocation8 + $0xa0] sm:$0xff]  }
 0x150   :  { %1058 = vmatpush1.bf16.msra.mxu0 %v2058_v47  ;;  %1140 = vmatpush1.bf16.msra.mxu1 %v2061_v48  ;;  %v2144_v47 = vld [vmem:[#allocation8 + $0x68] sm:$0xff]  }
 0x151   :  { %1059 = vmatprep.subr.bf16.mxu0 %v2066_v49  ;;  %1141 = vmatprep.subr.bf16.mxu1 %v2069_v50  ;;  %v2145_v48 = vld [vmem:[#allocation8 + $0xe8] sm:$0xff]  }
 0x152   :  { %v2146_v49 = vld [vmem:[#allocation8 + $0x28] sm:$0xff]  }
 0x153   :  { %v2147_v50 = vld [vmem:[#allocation8 + $0xa8] sm:$0xff]  }
 0x154   :  { %1060 = vmatpush1.bf16.msra.mxu0 %v2064_v51  ;;  %1142 = vmatpush1.bf16.msra.mxu1 %v2067_v52  ;;  %v2148_v51 = vld [vmem:[#allocation8 + $0x70] sm:$0xff]  }
 0x155   :  { %1061 = vmatprep.subr.bf16.mxu0 %v2072_v53  ;;  %1143 = vmatprep.subr.bf16.mxu1 %v2075_v54  ;;  %v2149_v52 = vld [vmem:[#allocation8 + $0xf0] sm:$0xff]  }
 0x156   :  { %v2150_v53 = vld [vmem:[#allocation8 + $0x30] sm:$0xff]  }
 0x157   :  { %v2151_v54 = vld [vmem:[#allocation8 + $0xb0] sm:$0xff]  }
 0x158   :  { %1062 = vmatpush1.bf16.msra.mxu0 %v2070_v55  ;;  %1144 = vmatpush1.bf16.msra.mxu1 %v2073_v56  ;;  %v2152_v55 = vld [vmem:[#allocation8 + $0x78] sm:$0xff]  }
 0x159   :  { %1063 = vmatprep.subr.bf16.mxu0 %v2078_v57  ;;  %1145 = vmatprep.subr.bf16.mxu1 %v2081_v58  ;;  %v2153_v56 = vld [vmem:[#allocation8 + $0xf8] sm:$0xff]  }
 0x15a   :  { %v2154_v57 = vld [vmem:[#allocation8 + $0x38] sm:$0xff]  }
 0x15b   :  { %v2155_v58 = vld [vmem:[#allocation8 + $0xb8] sm:$0xff]  }
 0x15c   :  { %1064 = vmatpush1.bf16.msra.mxu0 %v2076_v59  ;;  %1146 = vmatpush1.bf16.msra.mxu1 %v2079_v60  ;;  %v2314_v59 = vmov 0.0   ;;  %v346_v60 = vlaneseq }
 0x15d   :  { %1065 = vmatprep.subr.bf16.mxu0 %v2084_v61  ;;  %1147 = vmatprep.subr.bf16.mxu1 %v2087_v62 }
 0x15e   :  { %v347_v61 = vshrl.u32 %v346_v60, 7 }
 0x160   :  { %1066 = vmatpush1.bf16.msra.mxu0 %v2082_v63  ;;  %1148 = vmatpush1.bf16.msra.mxu1 %v2085_v0  ;;  %v348_v62 = vsub.s32 0, %v347_v61  ;;  %v356_v63 = vsub.s32 2, %v347_v61  ;;  %v344_v0 = vld [vmem:[%s2475_s3] sm:$0xf] }
 0x161   :  { %1067 = vmatprep.subr.bf16.mxu0 %v2090_v1  ;;  %1149 = vmatprep.subr.bf16.mxu1 %v2093_v2  ;;  %v352_v1 = vsub.s32 1, %v347_v61  ;;  %v360_v2 = vsub.s32 3, %v347_v61 }
 0x164   :  { %1068 = vmatpush1.bf16.msra.mxu0 %v2088_v3  ;;  %1150 = vmatpush1.bf16.msra.mxu1 %v2091_v4  ;;  %v349_v3 = vrot.slane %v344_v0, %v348_v62  ;;  %v357_v4 = vrot.slane %v344_v0, %v356_v63 }
 0x165   :  { %1069 = vmatprep.subr.bf16.mxu0 %v2096_v5  ;;  %1151 = vmatprep.subr.bf16.mxu1 %v2099_v6  ;;  %v353_v5 = vrot.slane %v344_v0, %v352_v1  ;;  %v361_v6 = vrot.slane %v344_v0, %v360_v2 }
 0x168   :  { %1070 = vmatpush1.bf16.msra.mxu0 %v2094_v7  ;;  %1152 = vmatpush1.bf16.msra.mxu1 %v2097_v8 }
 0x169   :  { %1071 = vmatprep.subr.bf16.mxu0 %v2102_v9  ;;  %1153 = vmatprep.subr.bf16.mxu1 %v2105_v10 }
 0x16c   :  { %1072 = vmatpush1.bf16.msra.mxu0 %v2100_v11  ;;  %1154 = vmatpush1.bf16.msra.mxu1 %v2103_v12 }
 0x16d   :  { %1073 = vmatprep.subr.bf16.mxu0 %v2108_v13  ;;  %1155 = vmatprep.subr.bf16.mxu1 %v2111_v14 }
 0x170   :  { %1074 = vmatpush1.bf16.msra.mxu0 %v2106_v15  ;;  %1156 = vmatpush1.bf16.msra.mxu1 %v2109_v16 }
 0x171   :  { %1075 = vmatprep.subr.bf16.mxu0 %v2114_v17  ;;  %1157 = vmatprep.subr.bf16.mxu1 %v2117_v18 }
 0x174   :  { %1076 = vmatpush1.bf16.msra.mxu0 %v2112_v19  ;;  %1158 = vmatpush1.bf16.msra.mxu1 %v2115_v20 }
 0x175   :  { %1077 = vmatprep.subr.bf16.mxu0 %v2120_v21  ;;  %1159 = vmatprep.subr.bf16.mxu1 %v2123_v22 }
 0x178   :  { %1078 = vmatpush1.bf16.msra.mxu0 %v2118_v23  ;;  %1160 = vmatpush1.bf16.msra.mxu1 %v2121_v24 }
 0x179   :  { %1830 = vmatprep.subr.bf16.mxu0 %v2124_v26  ;;  %1852 = vmatprep.subr.bf16.mxu1 %v2125_v28 }
 0x17b   :  { %1080 = vmatmul.mubr.bf16.vlgmr.msra.gmra.mrb[0].mxu0 %v214_v31  ;;  %1162 = vmatmul.mubr.bf16.vlgmr.msra.gmra.mrb[8].mxu1 %v214_v31  ;;  %v2159_v31 = vld [vmem:[#allocation10 + $0x18] sm:$0xff]  }
 0x17c   :  { %1831 = vmatpush3.bf16.msra.mxu0 %v2126_v29  ;;  %1853 = vmatpush3.bf16.msra.mxu1 %v2127_v30  ;;  %v2157_v29 = vld [vmem:[#allocation10 + $0x8] sm:$0xff]   ;;  %v2158_v30 = vld [vmem:[#allocation10 + $0x10] sm:$0xff]  }
 0x17d   :  { %1832 = vmatprep.subr.bf16.mxu0 %v2128_v32  ;;  %1854 = vmatprep.subr.bf16.mxu1 %v2129_v33  ;;  %v2160_v32 = vld [vmem:[#allocation10 + $0x20] sm:$0xff]   ;;  %v2161_v33 = vld [vmem:[#allocation10 + $0x28] sm:$0xff]  }
 0x180   :  { %1833 = vmatpush3.bf16.msra.mxu0 %v2130_v34  ;;  %1855 = vmatpush3.bf16.msra.mxu1 %v2131_v35  ;;  %v2162_v34 = vld [vmem:[#allocation10 + $0x30] sm:$0xff]   ;;  %v2163_v35 = vld [vmem:[#allocation10 + $0x38] sm:$0xff]  }
 0x181   :  { %1834 = vmatprep.subr.bf16.mxu0 %v2132_v27  ;;  %1856 = vmatprep.subr.bf16.mxu1 %v2133_v36 }
 0x184   :  { %1835 = vmatpush3.bf16.msra.mxu0 %v2134_v37  ;;  %1857 = vmatpush3.bf16.msra.mxu1 %v2135_v38  ;;  %v1788_v37 = vld [vmem:[%s2477_s5] ss:$0 sm:$0xff]  ;;  %s2274_s5 = scalar_lea.vmem %s1642_s24, 128 }
 0x185   :  { %1836 = vmatprep.subr.bf16.mxu0 %v2136_v39  ;;  %1858 = vmatprep.subr.bf16.mxu1 %v2137_v40  ;;  %p2275_p12 = scmp.ne.s32.totalorder %s1642_s24, %s2274_s5  ;;  %p2280_p0 = scmp.lt.s32.totalorder %s2274_s5, %s2274_s5 }
 0x187   :  { %p2281_p1 = por %p2280_p0, %p2279_p13 }
 0x188   :  { %1837 = vmatpush3.bf16.msra.mxu0 %v2138_v41  ;;  %1859 = vmatpush3.bf16.msra.mxu1 %v2139_v42 }
 0x189   :  { %1838 = vmatprep.subr.bf16.mxu0 %v2140_v43  ;;  %1860 = vmatprep.subr.bf16.mxu1 %v2141_v44  ;;  %p2282_p2 = pnand %p2281_p1, %p2275_p12 }
 0x18c   :  { %1839 = vmatpush3.bf16.msra.mxu0 %v2142_v45  ;;  %1861 = vmatpush3.bf16.msra.mxu1 %v2143_v46 }
 0x18d   :  { %1840 = vmatprep.subr.bf16.mxu0 %v2144_v47  ;;  %1862 = vmatprep.subr.bf16.mxu1 %v2145_v48 }
 0x190   :  { %1841 = vmatpush3.bf16.msra.mxu0 %v2146_v49  ;;  %1863 = vmatpush3.bf16.msra.mxu1 %v2147_v50  ;;  %v1821_v50 = vld [vmem:[%s2479_s7] ss:$0 sm:$0xff] }
 0x191   :  { %1842 = vmatprep.subr.bf16.mxu0 %v2148_v51  ;;  %1864 = vmatprep.subr.bf16.mxu1 %v2149_v52 }
 0x194   :  { %1843 = vmatpush3.bf16.msra.mxu0 %v2150_v53  ;;  %1865 = vmatpush3.bf16.msra.mxu1 %v2151_v54 }
 0x195   :  { %1844 = vmatprep.subr.bf16.mxu0 %v2152_v55  ;;  %1866 = vmatprep.subr.bf16.mxu1 %v2153_v56 }
 0x198   :  { %1845 = vmatpush3.bf16.msra.mxu0 %v2154_v57  ;;  %1867 = vmatpush3.bf16.msra.mxu1 %v2155_v58 }
 0x199   :  { %1883 = vmatprep.subr.bf16.mxu0 %v2314_v59 }
 0x24e   :  { %v1081_v7 = vpop.f32.mrb[0].mxu0  ;;  %v1163_v8 = vpop.f32.mrb[8].mxu1 }
 0x24f   :  { %v1903_v9 = vadd.f32 %v1081_v7, %v349_v3  ;;  %v1905_v10 = vadd.f32 %v1163_v8, %v357_v4  ;;  %v1083_v11 = vpop.f32.mrb[1].mxu0  ;;  %v1165_v12 = vpop.f32.mrb[9].mxu1 }
 0x250   :  { %v1904_v13 = vadd.f32 %v1083_v11, %v353_v5  ;;  %v1906_v14 = vadd.f32 %v1165_v12, %v361_v6  ;;  %v1085_v15 = vpop.f32.mrb[2].mxu0  ;;  %v1167_v16 = vpop.f32.mrb[10].mxu1 }
 0x251   :  { %v1170_v17 = vmax.f32 %v1903_v9, 0.0  ;;  %v1172_v18 = vmax.f32 %v1905_v10, 0.0  ;;  %v1086_v19 = vpop.f32.mrb[3].mxu0  ;;  %v1168_v20 = vpop.f32.mrb[11].mxu1 }
 0x252   :  { %v1171_v21 = vmax.f32 %v1904_v13, 0.0  ;;  %v1173_v22 = vmax.f32 %v1906_v14, 0.0 }
 0x253   :  { %v1174_v26 = vpack.c.bf16 %v1170_v17, %v1170_v17  ;;  %v1176_v28 = vpack.c.bf16 %v1172_v18, %v1172_v18 }
 0x254   :  { %v1175_v23 = vpack.c.bf16 %v1171_v21, %v1171_v21  ;;  %v1177_v24 = vpack.c.bf16 %v1173_v22, %v1173_v22 }
 0x256   :  { %1473 = vmatprep.mubr.bf16.mxu0 %v1175_v23  ;;  %1513 = vmatprep.mubr.bf16.mxu1 %v1177_v24 }
 0x257   :  { %1474 = vmatmul.mubr.bf16.vlgmr.msra.gmra.mrb[4].mxu0 %v1174_v26  ;;  %1514 = vmatmul.mubr.bf16.vlgmr.msra.gmra.mrb[12].mxu1 %v1176_v28 }
 0x258   :  { %1884 = vmatpush3.bf16.msra.mxu0 %v2156_v25  ;;  %1899 = vmatprep.mubr.msk.bf16.mxu0 %vm2315_vm2, %v2314_v59 }
 0x259   :  { %1885 = vmatprep.subr.bf16.mxu0 %v2314_v59 }
 0x25c   :  { %1886 = vmatpush3.bf16.msra.mxu0 %v2157_v29 }
 0x25d   :  { %1887 = vmatprep.subr.bf16.mxu0 %v2314_v59 }
 0x260   :  { %1888 = vmatpush3.bf16.msra.mxu0 %v2158_v30 }
 0x261   :  { %1889 = vmatprep.subr.bf16.mxu0 %v2314_v59 }
 0x264   :  { %1890 = vmatpush3.bf16.msra.mxu0 %v2159_v31 }
 0x265   :  { %1891 = vmatprep.subr.bf16.mxu0 %v2314_v59 }
 0x268   :  { %1892 = vmatpush3.bf16.msra.mxu0 %v2160_v32 }
 0x269   :  { %1893 = vmatprep.subr.bf16.mxu0 %v2314_v59 }
 0x26c   :  { %1894 = vmatpush3.bf16.msra.mxu0 %v2161_v33 }
 0x26d   :  { %1895 = vmatprep.subr.bf16.mxu0 %v2314_v59 }
 0x270   :  { %1896 = vmatpush3.bf16.msra.mxu0 %v2162_v34 }
 0x271   :  { %1897 = vmatprep.subr.bf16.mxu0 %v2314_v59 }
 0x274   :  { %1898 = vmatpush3.bf16.msra.mxu0 %v2163_v35 }
 0x32a   :  { %v1846_v27 = vpop.f32.mrb[4].mxu0  ;;  %v1868_v36 = vpop.f32.mrb[12].mxu1 }
 0x32b   :  { %v1847_v38 = vpop.f32.mrb[5].mxu0  ;;  %v1869_v39 = vpop.f32.mrb[13].mxu1 }
 0x32c   :  { %v1848_v40 = vadd.f32 %v1847_v38, %v1846_v27  ;;  %v1870_v41 = vadd.f32 %v1869_v39, %v1868_v36  ;;  %v1849_v42 = vpop.f32.mrb[6].mxu0  ;;  %v1871_v43 = vpop.f32.mrb[14].mxu1 }
 0x32d   :  { %v1850_v44 = vpop.f32.mrb[7].mxu0  ;;  %v1872_v45 = vpop.f32.mrb[15].mxu1 }
 0x32e   :  { %v1476_v46 = vadd.f32 %v1848_v40, %v1788_v37 }
 0x330   :  { %v1516_v47 = vadd.f32 %v1870_v41, %v1476_v46 }
 0x332   :  { %v1521_v48 = vmax.f32 %v1516_v47, 0.0 }
 0x334   :  { %v1522_v49 = vpack.c.bf16 %v1521_v48, %v1521_v48 }
 0x336   :  { %1900 = vmatmul.mubr.bf16.vlgmr.msra.gmra.mrb[8].mxu0 %v1522_v49 }
 0x409   :  { %v1628_v51 = vpop.f32.mrb[8].mxu0 }
 0x40a   :  { %v1629_v52 = vadd.f32 %v1821_v50, %v1628_v51  ;;  %v1901_v53 = vpop.f32.mrb[9].mxu0 }
 0x40b   :  { %v1631_v54 = vpop.f32.mrb[10].mxu0 }
 0x40c   :  { %1634 = vst [vmem:[#allocation11] sm:$0xff] %v1629_v52  ;;  %v1902_v55 = vpop.f32.mrb[11].mxu0 }
 0x40d   :  { %2285 = shalt.err (!%p2282_p2)
}
 0x40e   :  { %s2286_s7 = scalar_lea.hbm %s2480_s8, 128 }
 0x40f   :  { %p2287_p3 = scmp.ne.s32.totalorder %s2480_s8, %s2286_s7  ;;  %p2290_p4 = scmp.lt.u32.totalorder %s2286_s7, %s2480_s8 }
 0x411   :  { %p2292_p5 = pnand %p2290_p4, %p2287_p3 }
 0x413   :  { %2295 = shalt.err (!%p2292_p5)
}
 0x414   :  { %1644 = dma.vmem_to_hbm [thread:$0]  %s1642_s24, 128, %s2480_s8, [#allocation4]  }
 0x415   :  { %2302 = dma.done.wait [#allocation4], 128  }
 0x416   :  { %2303 = vsyncadd [#allocation4], 4294967168 }
 0x417   :  { %1648 = vsyncpa [#allocation3], 1 }
 0x418   :  { %1649 = vsyncpa [#allocation6], 1 }
 0x419   :  { %1650 = vsyncpa [#allocation9], 1 }
 0x41a   :  { %1651 = vsyncpa [#allocation4], 1 }

// kernel: tpu_custom_call.1
= control target key start
LH: loop header
LB: loop body
LE: loop exit
PB: predicated region body
PF: predicated region fallthrough
CT: control target
= control target key end

     0   :  { %13 = vsyncpa [#allocation3], 0  ;;  %s2472_s0 = inlined_call_operand.hbm [shape: f32[8,8], index: 0, kind: input, shape index: {}]   ;;  %s2473_s1 = inlined_call_operand.hbm [shape: bf16[8,512], index: 1, kind: input, shape index: {}]   ;;  %s2474_s2 = inlined_call_operand.hbm [shape: bf16[512,512], index: 2, kind: input, shape index: {}]   ;;  %s2475_s3 = inlined_call_operand.vmem [shape: f32[1,512], index: 3, kind: input, shape index: {}]   ;;  %s2476_s4 = inlined_call_operand.hbm [shape: bf16[512,128], index: 4, kind: input, shape index: {}]   ;;  %s2477_s5 = inlined_call_operand.vmem [shape: f32[1,128], index: 5, kind: input, shape index: {}]   ;;  %s2478_s6 = inlined_call_operand.hbm [shape: bf16[128,128], index: 6, kind: input, shape index: {}]   ;;  %s2479_s7 = inlined_call_operand.vmem [shape: f32[1,128], index: 7, kind: input, shape index: {}]   ;;  %s2480_s8 = inlined_call_operand.hbm [shape: f32[8,128], index: 8, kind: output, shape index: {}]  }
   0x1   :  { %14 = vsyncpa [#allocation6], 0 }
   0x2   :  { %15 = vsyncpa [#allocation9], 0 }
   0x3   :  { %16 = vsyncpa [#allocation4], 0  ;;  %s2304_s27 = smov [#allocation5]   ;;  %s2305_s29 = smov [#allocation8]  }
   0x4   :  { %s33_s28 = sshll.u32 %s2304_s27, 4  ;;  %s56_s30 = sshll.u32 %s2305_s29, 4  ;;  %s34_s28 = int_to_ptr.vmem [resolvable:$true] %s33_s28  ;;  %s2362_s30 = int_to_ptr.vmem [resolvable:$true] %s56_s30 }
   0x5   :  { %s2164_s11 = scalar_lea.hbm %s2473_s1, 256 }
   0x6   :  { %p2165_p0 = scmp.ne.s32.totalorder %s2473_s1, %s2164_s11  ;;  %p2168_p1 = scmp.lt.u32.totalorder %s2164_s11, %s2473_s1 }
   0x8   :  { %p2170_p2 = pnand %p2168_p1, %p2165_p0 }
   0xa   :  { %2173 = shalt.err (!%p2170_p2)
}
   0xb   :  { %s2174_s16 = scalar_lea.vmem %s34_s28, 256  ;;  %p2179_p4 = scmp.lt.s32.totalorder %s34_s28, %s34_s28 }
   0xc   :  { %p2175_p3 = scmp.ne.s32.totalorder %s34_s28, %s2174_s16  ;;  %p2180_p5 = scmp.lt.s32.totalorder %s2174_s16, %s2174_s16 }
   0xe   :  { %p2181_p6 = por %p2180_p5, %p2179_p4 }
  0x10   :  { %p2182_p7 = pnand %p2181_p6, %p2175_p3 }
  0x12   :  { %2185 = shalt.err (!%p2182_p7)
}
  0x13   :  { %36 = dma.hbm_to_vmem [thread:$0]  %s2473_s1, 256, %s34_s28, [#allocation6]  }
  0x14   :  { %s2186_s21 = scalar_lea.hbm %s2476_s4, 4096 }
  0x15   :  { %p2187_p8 = scmp.ne.s32.totalorder %s2476_s4, %s2186_s21  ;;  %p2190_p9 = scmp.lt.u32.totalorder %s2186_s21, %s2476_s4 }
  0x17   :  { %p2192_p10 = pnand %p2190_p9, %p2187_p8 }
  0x19   :  { %2195 = shalt.err (!%p2192_p10)
}
  0x1a   :  { %s2196_s26 = scalar_lea.vmem %s2362_s30, 4096  ;;  %p2201_p12 = scmp.lt.s32.totalorder %s2362_s30, %s2362_s30 }
  0x1b   :  { %p2197_p11 = scmp.ne.s32.totalorder %s2362_s30, %s2196_s26  ;;  %p2202_p13 = scmp.lt.s32.totalorder %s2196_s26, %s2196_s26 }
  0x1d   :  { %p2203_p0 = por %p2202_p13, %p2201_p12 }
  0x1f   :  { %p2204_p1 = pnand %p2203_p0, %p2197_p11 }
  0x21   :  { %2207 = shalt.err (!%p2204_p1)
}
  0x22   :  { %s2306_s1 = smov 64   ;;  %s2307_s27 = smov 4  }
  0x23   :  { %62 = dma.hbm_to_vmem [thread:$0]  %s2476_s4, 4096, %s2362_s30, [#allocation9], %s2306_s1, %s2306_s1, %s2307_s27  }
  0x24   :  { %s2308_s9 = smov [#allocation2]   ;;  %s2309_s11 = smov [#allocation7]  }
  0x25   :  { %s23_s10 = sshll.u32 %s2308_s9, 4  ;;  %s42_s12 = sshll.u32 %s2309_s11, 4  ;;  %s24_s10 = int_to_ptr.vmem [resolvable:$true] %s23_s10  ;;  %s2396_s12 = int_to_ptr.vmem [resolvable:$true] %s42_s12 }
  0x26   :  { %s2208_s15 = scalar_lea.hbm %s2472_s0, 128 }
  0x27   :  { %p2209_p2 = scmp.ne.s32.totalorder %s2472_s0, %s2208_s15  ;;  %p2212_p3 = scmp.lt.u32.totalorder %s2208_s15, %s2472_s0 }
  0x29   :  { %p2214_p4 = pnand %p2212_p3, %p2209_p2 }
  0x2b   :  { %2217 = shalt.err (!%p2214_p4)
}
  0x2c   :  { %s2218_s4 = scalar_lea.vmem %s24_s10, 128  ;;  %p2223_p6 = scmp.lt.s32.totalorder %s24_s10, %s24_s10 }
  0x2d   :  { %p2219_p5 = scmp.ne.s32.totalorder %s24_s10, %s2218_s4  ;;  %p2224_p7 = scmp.lt.s32.totalorder %s2218_s4, %s2218_s4 }
  0x2f   :  { %p2225_p8 = por %p2224_p7, %p2223_p6 }
  0x31   :  { %p2226_p9 = pnand %p2225_p8, %p2219_p5 }
  0x33   :  { %2229 = shalt.err (!%p2226_p9)
}
  0x34   :  { %26 = dma.hbm_to_vmem [thread:$0]  %s2472_s0, 128, %s24_s10, [#allocation3]  }
  0x35   :  { %s2230_s23 = scalar_lea.hbm %s2474_s2, 16384 }
  0x36   :  { %p2231_p10 = scmp.ne.s32.totalorder %s2474_s2, %s2230_s23  ;;  %p2234_p11 = scmp.lt.u32.totalorder %s2230_s23, %s2474_s2 }
  0x38   :  { %p2236_p12 = pnand %p2234_p11, %p2231_p10 }
  0x3a   :  { %2239 = shalt.err (!%p2236_p12)
}
  0x3b   :  { %s2240_s29 = scalar_lea.vmem %s2396_s12, 16384  ;;  %p2245_p0 = scmp.lt.s32.totalorder %s2396_s12, %s2396_s12 }
  0x3c   :  { %p2241_p13 = scmp.ne.s32.totalorder %s2396_s12, %s2240_s29  ;;  %p2246_p1 = scmp.lt.s32.totalorder %s2240_s29, %s2240_s29 }
  0x3e   :  { %p2247_p2 = por %p2246_p1, %p2245_p0 }
  0x40   :  { %p2248_p3 = pnand %p2247_p2, %p2241_p13 }
  0x42   :  { %2251 = shalt.err (!%p2248_p3)
}
  0x43   :  { %s2310_s0 = smov 256   ;;  %s2311_s9 = smov 16  }
  0x44   :  { %48 = dma.hbm_to_vmem [thread:$0]  %s2474_s2, 16384, %s2396_s12, [#allocation6], %s2310_s0, %s2310_s0, %s2311_s9  }
  0x45   :  { %s2312_s13 = smov [#allocation10]   ;;  %s2252_s17 = scalar_lea.hbm %s2478_s6, 1024 }
  0x46   :  { %s70_s14 = sshll.u32 %s2312_s13, 4  ;;  %p2253_p4 = scmp.ne.s32.totalorder %s2478_s6, %s2252_s17  ;;  %s71_s14 = int_to_ptr.vmem [resolvable:$true] %s70_s14 }
  0x47   :  { %p2256_p5 = scmp.lt.u32.totalorder %s2252_s17, %s2478_s6 }
  0x49   :  { %p2258_p6 = pnand %p2256_p5, %p2253_p4 }
  0x4b   :  { %2261 = shalt.err (!%p2258_p6)
}
  0x4c   :  { %s2262_s20 = scalar_lea.vmem %s71_s14, 1024  ;;  %p2267_p8 = scmp.lt.s32.totalorder %s71_s14, %s71_s14 }
  0x4d   :  { %p2263_p7 = scmp.ne.s32.totalorder %s71_s14, %s2262_s20  ;;  %p2268_p9 = scmp.lt.s32.totalorder %s2262_s20, %s2262_s20 }
  0x4f   :  { %p2269_p10 = por %p2268_p9, %p2267_p8 }
  0x51   :  { %p2270_p11 = pnand %p2269_p10, %p2263_p7 }
  0x53   :  { %2273 = shalt.err (!%p2270_p11)
}
  0x54   :  { %76 = dma.hbm_to_vmem [thread:$0]  %s2478_s6, 1024, %s71_s14, [#allocation9], %s2306_s1, %s2306_s1, %s2307_s27  }
  0x55   :  { %2296 = dma.done.wait [#allocation3], 128  }
  0x56   :  { %2297 = vsyncadd [#allocation3], 4294967168 }
  0x57   :  { %2298 = dma.done.wait [#allocation6], 16640  }
  0x58   :  { %2299 = vsyncadd [#allocation6], 4294950656 }
  0x59   :  { %2300 = dma.done.wait [#allocation9], 5120  }
  0x5a   :  { %2301 = vsyncadd [#allocation9], 4294962176  ;;  %v2313_v0 = vmov 0   ;;  %v97_v1 = vld [vmem:[#allocation5] sm:$0xff]  ;;  %vm113_vm0 = vcmask 1043456   ;;  %v95_v2 = vld [vmem:[#allocation2] sm:$0xff] }
  0x5b   :  { %158 = vmatprep.mubr.bf16.mxu1 %v2313_v0  ;;  %v98_v3 = vld [vmem:[#allocation5 + $0x8] sm:$0xff]  ;;  %v1653_v4 = vcombine.high %v97_v1, %v97_v1  ;;  %v1652_v5 = vcombine.low %v97_v1, %v97_v1  ;;  %v1932_v7 = vld [vmem:[#allocation7 + $0x4] ss:$16 sps:$4 sm:$0xff]   ;;  %v96_v10 = vpack.c.bf16 %v95_v2, %v95_v2  ;;  %v1937_v11 = vld [vmem:[#allocation7] ss:$16 sps:$4 sm:$0xff]   ;;  %vm109_vm1 = vcmask 64512  }
  0x5c   :  { %v1655_v6 = vcombine.high %v98_v3, %v98_v3  ;;  %v1654_v8 = vcombine.low %v98_v3, %v98_v3  ;;  %1006 = vmatprep.subr.bf16.mxu0 %v1932_v7  ;;  %v1938_v12 = vld [vmem:[#allocation7 + $0x24] ss:$16 sps:$4 sm:$0xff]   ;;  %v1936_v14 = vld [vmem:[#allocation7 + $0xc] ss:$16 sps:$4 sm:$0xff]   ;;  %v1943_v15 = vld [vmem:[#allocation7 + $0x20] ss:$16 sps:$4 sm:$0xff]  }
  0x5d   :  { %1656 = vmatprep.subr.msk.bf16.mxu1 %vm113_vm0, %v1653_v4  ;;  %v115_v9 = vsel %vm113_vm0, %v1652_v5, 0  ;;  %1007 = vmatpush1.bf16.msra.mxu0 %v1937_v11  ;;  %v1944_v16 = vld [vmem:[#allocation7 + $0x44] ss:$16 sps:$4 sm:$0xff]   ;;  %v1949_v17 = vld [vmem:[#allocation7 + $0x40] ss:$16 sps:$4 sm:$0xff]   ;;  %vm2315_vm2 = vmmov 0  }
  0x5e   :  { %127 = vmatpush1.bf16.msra.mxu1 %v115_v9  ;;  %v121_v13 = vsel %vm113_vm0, %v1654_v8, 0  ;;  %1008 = vmatprep.subr.bf16.mxu0 %v1938_v12  ;;  %v1950_v18 = vld [vmem:[#allocation7 + $0x64] ss:$16 sps:$4 sm:$0xff]   ;;  %v1934_v19 = vld [vmem:[#allocation7 + $0x8] ss:$16 sps:$4 sm:$0xff]   ;;  %s2316_s23 = smov [#allocation11]  }
  0x5f   :  { %1658 = vmatprep.subr.msk.bf16.mxu1 %vm113_vm0, %v1655_v6  ;;  %v1942_v20 = vld [vmem:[#allocation7 + $0x2c] ss:$16 sps:$4 sm:$0xff]   ;;  %v1955_v21 = vld [vmem:[#allocation7 + $0x60] ss:$16 sps:$4 sm:$0xff]   ;;  %v1956_v22 = vld [vmem:[#allocation7 + $0x84] ss:$16 sps:$4 sm:$0xff]  }
  0x60   :  { %v1940_v23 = vld [vmem:[#allocation7 + $0x28] ss:$16 sps:$4 sm:$0xff]   ;;  %v1948_v24 = vld [vmem:[#allocation7 + $0x4c] ss:$16 sps:$4 sm:$0xff]   ;;  %v1961_v25 = vld [vmem:[#allocation7 + $0x80] ss:$16 sps:$4 sm:$0xff]  }
  0x61   :  { %1657 = vmatmul.mubr.msk.bf16.vlgmr.msra.gmra.mrb[0].mxu1 %vm109_vm1, %v96_v10  ;;  %1009 = vmatpush1.bf16.msra.mxu0 %v1943_v15  ;;  %v1962_v26 = vld [vmem:[#allocation7 + $0xa4] ss:$16 sps:$4 sm:$0xff]   ;;  %v1946_v27 = vld [vmem:[#allocation7 + $0x48] ss:$16 sps:$4 sm:$0xff]   ;;  %v1954_v28 = vld [vmem:[#allocation7 + $0x6c] ss:$16 sps:$4 sm:$0xff]  }
  0x62   :  { %168 = vmatpush1.bf16.msra.mxu1 %v121_v13  ;;  %199 = vmatprep.mubr.bf16.mxu1 %v2313_v0  ;;  %v1967_v29 = vld [vmem:[#allocation7 + $0xa0] ss:$16 sps:$4 sm:$0xff]   ;;  %v1968_v30 = vld [vmem:[#allocation7 + $0xc4] ss:$16 sps:$4 sm:$0xff]   ;;  %v1952_v31 = vld [vmem:[#allocation7 + $0x68] ss:$16 sps:$4 sm:$0xff]  }
  0x63   :  { %1088 = vmatprep.subr.bf16.mxu1 %v1936_v14  ;;  %1010 = vmatprep.subr.bf16.mxu0 %v1944_v16  ;;  %v1960_v32 = vld [vmem:[#allocation7 + $0x8c] ss:$16 sps:$4 sm:$0xff]   ;;  %v1973_v33 = vld [vmem:[#allocation7 + $0xc0] ss:$16 sps:$4 sm:$0xff]   ;;  %v1974_v34 = vld [vmem:[#allocation7 + $0xe4] ss:$16 sps:$4 sm:$0xff]  }
  0x64   :  { %v1958_v35 = vld [vmem:[#allocation7 + $0x88] ss:$16 sps:$4 sm:$0xff]   ;;  %v1966_v36 = vld [vmem:[#allocation7 + $0xac] ss:$16 sps:$4 sm:$0xff]   ;;  %v1979_v37 = vld [vmem:[#allocation7 + $0xe0] ss:$16 sps:$4 sm:$0xff]  }
  0x65   :  { %1011 = vmatpush1.bf16.msra.mxu0 %v1949_v17  ;;  %v1980_v38 = vld [vmem:[#allocation7 + $0x104] ss:$16 sps:$4 sm:$0xff]   ;;  %v1964_v39 = vld [vmem:[#allocation7 + $0xa8] ss:$16 sps:$4 sm:$0xff]   ;;  %v1972_v40 = vld [vmem:[#allocation7 + $0xcc] ss:$16 sps:$4 sm:$0xff]  }
  0x66   :  { %1012 = vmatprep.subr.bf16.mxu0 %v1950_v18  ;;  %v1985_v41 = vld [vmem:[#allocation7 + $0x100] ss:$16 sps:$4 sm:$0xff]   ;;  %v1986_v42 = vld [vmem:[#allocation7 + $0x124] ss:$16 sps:$4 sm:$0xff]   ;;  %v1970_v43 = vld [vmem:[#allocation7 + $0xc8] ss:$16 sps:$4 sm:$0xff]  }
  0x67   :  { %v1978_v44 = vld [vmem:[#allocation7 + $0xec] ss:$16 sps:$4 sm:$0xff]   ;;  %v1991_v45 = vld [vmem:[#allocation7 + $0x120] ss:$16 sps:$4 sm:$0xff]   ;;  %v1992_v46 = vld [vmem:[#allocation7 + $0x144] ss:$16 sps:$4 sm:$0xff]  }
  0x68   :  { %v1976_v47 = vld [vmem:[#allocation7 + $0xe8] ss:$16 sps:$4 sm:$0xff]   ;;  %v1984_v48 = vld [vmem:[#allocation7 + $0x10c] ss:$16 sps:$4 sm:$0xff]   ;;  %v1997_v49 = vld [vmem:[#allocation7 + $0x140] ss:$16 sps:$4 sm:$0xff]  }
  0x69   :  { %1659 = vmatmul.mubr.msk.bf16.vlgmr.msra.gmra.mrb[4].mxu1 %vm109_vm1, %v96_v10  ;;  %1013 = vmatpush1.bf16.msra.mxu0 %v1955_v21  ;;  %v1998_v50 = vld [vmem:[#allocation7 + $0x164] ss:$16 sps:$4 sm:$0xff]   ;;  %v1982_v51 = vld [vmem:[#allocation7 + $0x108] ss:$16 sps:$4 sm:$0xff]   ;;  %v1990_v52 = vld [vmem:[#allocation7 + $0x12c] ss:$16 sps:$4 sm:$0xff]  }
  0x6a   :  { %1089 = vmatpush1.bf16.msra.mxu1 %v1934_v19  ;;  %1014 = vmatprep.subr.bf16.mxu0 %v1956_v22  ;;  %v2003_v53 = vld [vmem:[#allocation7 + $0x160] ss:$16 sps:$4 sm:$0xff]   ;;  %v2004_v54 = vld [vmem:[#allocation7 + $0x184] ss:$16 sps:$4 sm:$0xff]   ;;  %v1988_v55 = vld [vmem:[#allocation7 + $0x128] ss:$16 sps:$4 sm:$0xff]  }
  0x6b   :  { %1090 = vmatprep.subr.bf16.mxu1 %v1942_v20  ;;  %v1996_v56 = vld [vmem:[#allocation7 + $0x14c] ss:$16 sps:$4 sm:$0xff]   ;;  %v2009_v57 = vld [vmem:[#allocation7 + $0x180] ss:$16 sps:$4 sm:$0xff]   ;;  %v2010_v58 = vld [vmem:[#allocation7 + $0x1a4] ss:$16 sps:$4 sm:$0xff]  }
  0x6c   :  { %v1994_v59 = vld [vmem:[#allocation7 + $0x148] ss:$16 sps:$4 sm:$0xff]   ;;  %v2002_v60 = vld [vmem:[#allocation7 + $0x16c] ss:$16 sps:$4 sm:$0xff]   ;;  %v2015_v61 = vld [vmem:[#allocation7 + $0x1a0] ss:$16 sps:$4 sm:$0xff]  }
  0x6d   :  { %1015 = vmatpush1.bf16.msra.mxu0 %v1961_v25  ;;  %v2016_v62 = vld [vmem:[#allocation7 + $0x1c4] ss:$16 sps:$4 sm:$0xff]   ;;  %v2000_v63 = vld [vmem:[#allocation7 + $0x168] ss:$16 sps:$4 sm:$0xff]   ;;  %v2008_v0 = vld [vmem:[#allocation7 + $0x18c] ss:$16 sps:$4 sm:$0xff]  }
  0x6e   :  { %1091 = vmatpush1.bf16.msra.mxu1 %v1940_v23  ;;  %1016 = vmatprep.subr.bf16.mxu0 %v1962_v26  ;;  %v2021_v1 = vld [vmem:[#allocation7 + $0x1c0] ss:$16 sps:$4 sm:$0xff]   ;;  %v2006_v2 = vld [vmem:[#allocation7 + $0x188] ss:$16 sps:$4 sm:$0xff]   ;;  %v2014_v3 = vld [vmem:[#allocation7 + $0x1ac] ss:$16 sps:$4 sm:$0xff]  }
  0x6f   :  { %1092 = vmatprep.subr.bf16.mxu1 %v1948_v24  ;;  %v2012_v4 = vld [vmem:[#allocation7 + $0x1a8] ss:$16 sps:$4 sm:$0xff]   ;;  %v2020_v5 = vld [vmem:[#allocation7 + $0x1cc] ss:$16 sps:$4 sm:$0xff]   ;;  %v2022_v7 = vld [vmem:[#allocation7 + $0x1e4] ss:$16 sps:$4 sm:$0xff]  }
  0x70   :  { %v2018_v6 = vld [vmem:[#allocation7 + $0x1c8] ss:$16 sps:$4 sm:$0xff]   ;;  %v2026_v8 = vld [vmem:[#allocation7 + $0x1ec] ss:$16 sps:$4 sm:$0xff]   ;;  %v2027_v10 = vld [vmem:[#allocation7 + $0x1e0] ss:$16 sps:$4 sm:$0xff]  }
  0x71   :  { %1017 = vmatpush1.bf16.msra.mxu0 %v1967_v29  ;;  %v2024_v9 = vld [vmem:[#allocation7 + $0x1e8] ss:$16 sps:$4 sm:$0xff]   ;;  %v2030_v11 = vld [vmem:[#allocation7 + $0x204] ss:$16 sps:$4 sm:$0xff]   ;;  %v2033_v12 = vld [vmem:[#allocation7 + $0x20c] ss:$16 sps:$4 sm:$0xff]  }
  0x72   :  { %1093 = vmatpush1.bf16.msra.mxu1 %v1946_v27  ;;  %1018 = vmatprep.subr.bf16.mxu0 %v1968_v30  ;;  %v2028_v20 = vld [vmem:[#allocation7 + $0x200] ss:$16 sps:$4 sm:$0xff]   ;;  %v2031_v21 = vld [vmem:[#allocation7 + $0x208] ss:$16 sps:$4 sm:$0xff]   ;;  %v2036_v23 = vld [vmem:[#allocation7 + $0x224] ss:$16 sps:$4 sm:$0xff]  }
  0x73   :  { %1094 = vmatprep.subr.bf16.mxu1 %v1954_v28  ;;  %v2039_v24 = vld [vmem:[#allocation7 + $0x22c] ss:$16 sps:$4 sm:$0xff]   ;;  %v2034_v25 = vld [vmem:[#allocation7 + $0x220] ss:$16 sps:$4 sm:$0xff]   ;;  %v2037_v26 = vld [vmem:[#allocation7 + $0x228] ss:$16 sps:$4 sm:$0xff]  }
  0x74   :  { %v2042_v28 = vld [vmem:[#allocation7 + $0x244] ss:$16 sps:$4 sm:$0xff]   ;;  %v2045_v29 = vld [vmem:[#allocation7 + $0x24c] ss:$16 sps:$4 sm:$0xff]   ;;  %s1641_s24 = sshll.u32 %s2316_s23, 4  ;;  %s1642_s24 = int_to_ptr.vmem [resolvable:$true] %s1641_s24 }
  0x75   :  { %1019 = vmatpush1.bf16.msra.mxu0 %v1973_v33  ;;  %p2279_p13 = scmp.lt.s32.totalorder %s1642_s24, %s1642_s24 }
  0x76   :  { %1095 = vmatpush1.bf16.msra.mxu1 %v1952_v31  ;;  %1020 = vmatprep.subr.bf16.mxu0 %v1974_v34  ;;  %v2040_v34 = vld [vmem:[#allocation7 + $0x240] ss:$16 sps:$4 sm:$0xff]  }
  0x77   :  { %1096 = vmatprep.subr.bf16.mxu1 %v1960_v32 }
  0x79   :  { %1021 = vmatpush1.bf16.msra.mxu0 %v1979_v37  ;;  %v2048_v37 = vld [vmem:[#allocation7 + $0x264] ss:$16 sps:$4 sm:$0xff]  }
  0x7a   :  { %1097 = vmatpush1.bf16.msra.mxu1 %v1958_v35  ;;  %1022 = vmatprep.subr.bf16.mxu0 %v1980_v38  ;;  %v2043_v35 = vld [vmem:[#allocation7 + $0x248] ss:$16 sps:$4 sm:$0xff]   ;;  %v2051_v38 = vld [vmem:[#allocation7 + $0x26c] ss:$16 sps:$4 sm:$0xff]  }
  0x7b   :  { %1098 = vmatprep.subr.bf16.mxu1 %v1966_v36 }
  0x7d   :  { %1023 = vmatpush1.bf16.msra.mxu0 %v1985_v41  ;;  %v2054_v41 = vld [vmem:[#allocation7 + $0x284] ss:$16 sps:$4 sm:$0xff]  }
  0x7e   :  { %1099 = vmatpush1.bf16.msra.mxu1 %v1964_v39  ;;  %1024 = vmatprep.subr.bf16.mxu0 %v1986_v42  ;;  %v2046_v39 = vld [vmem:[#allocation7 + $0x260] ss:$16 sps:$4 sm:$0xff]   ;;  %v2057_v42 = vld [vmem:[#allocation7 + $0x28c] ss:$16 sps:$4 sm:$0xff]  }
  0x7f   :  { %1100 = vmatprep.subr.bf16.mxu1 %v1972_v40  ;;  %v2049_v40 = vld [vmem:[#allocation7 + $0x268] ss:$16 sps:$4 sm:$0xff]  }
  0x81   :  { %1025 = vmatpush1.bf16.msra.mxu0 %v1991_v45  ;;  %v2060_v45 = vld [vmem:[#allocation7 + $0x2a4] ss:$16 sps:$4 sm:$0xff]  }
  0x82   :  { %1101 = vmatpush1.bf16.msra.mxu1 %v1970_v43  ;;  %1026 = vmatprep.subr.bf16.mxu0 %v1992_v46  ;;  %v2052_v43 = vld [vmem:[#allocation7 + $0x280] ss:$16 sps:$4 sm:$0xff]   ;;  %v2063_v46 = vld [vmem:[#allocation7 + $0x2ac] ss:$16 sps:$4 sm:$0xff]  }
  0x83   :  { %1102 = vmatprep.subr.bf16.mxu1 %v1978_v44  ;;  %v2055_v44 = vld [vmem:[#allocation7 + $0x288] ss:$16 sps:$4 sm:$0xff]  }
  0x85   :  { %1027 = vmatpush1.bf16.msra.mxu0 %v1997_v49  ;;  %v2066_v49 = vld [vmem:[#allocation7 + $0x2c4] ss:$16 sps:$4 sm:$0xff]  }
  0x86   :  { %1103 = vmatpush1.bf16.msra.mxu1 %v1976_v47  ;;  %1028 = vmatprep.subr.bf16.mxu0 %v1998_v50  ;;  %v2058_v47 = vld [vmem:[#allocation7 + $0x2a0] ss:$16 sps:$4 sm:$0xff]   ;;  %v2069_v50 = vld [vmem:[#allocation7 + $0x2cc] ss:$16 sps:$4 sm:$0xff]  }
  0x87   :  { %1104 = vmatprep.subr.bf16.mxu1 %v1984_v48  ;;  %v2061_v48 = vld [vmem:[#allocation7 + $0x2a8] ss:$16 sps:$4 sm:$0xff]  }
  0x89   :  { %1029 = vmatpush1.bf16.msra.mxu0 %v2003_v53  ;;  %v2072_v53 = vld [vmem:[#allocation7 + $0x2e4] ss:$16 sps:$4 sm:$0xff]  }
  0x8a   :  { %1105 = vmatpush1.bf16.msra.mxu1 %v1982_v51  ;;  %1030 = vmatprep.subr.bf16.mxu0 %v2004_v54  ;;  %v2064_v51 = vld [vmem:[#allocation7 + $0x2c0] ss:$16 sps:$4 sm:$0xff]   ;;  %v2075_v54 = vld [vmem:[#allocation7 + $0x2ec] ss:$16 sps:$4 sm:$0xff]  }
  0x8b   :  { %1106 = vmatprep.subr.bf16.mxu1 %v1990_v52  ;;  %v2067_v52 = vld [vmem:[#allocation7 + $0x2c8] ss:$16 sps:$4 sm:$0xff]  }
  0x8d   :  { %1031 = vmatpush1.bf16.msra.mxu0 %v2009_v57  ;;  %v2078_v57 = vld [vmem:[#allocation7 + $0x304] ss:$16 sps:$4 sm:$0xff]  }
  0x8e   :  { %1107 = vmatpush1.bf16.msra.mxu1 %v1988_v55  ;;  %1032 = vmatprep.subr.bf16.mxu0 %v2010_v58  ;;  %v2070_v55 = vld [vmem:[#allocation7 + $0x2e0] ss:$16 sps:$4 sm:$0xff]   ;;  %v2081_v58 = vld [vmem:[#allocation7 + $0x30c] ss:$16 sps:$4 sm:$0xff]  }
  0x8f   :  { %1108 = vmatprep.subr.bf16.mxu1 %v1996_v56  ;;  %v2073_v56 = vld [vmem:[#allocation7 + $0x2e8] ss:$16 sps:$4 sm:$0xff]  }
  0x91   :  { %1033 = vmatpush1.bf16.msra.mxu0 %v2015_v61  ;;  %v2084_v61 = vld [vmem:[#allocation7 + $0x324] ss:$16 sps:$4 sm:$0xff]  }
  0x92   :  { %1109 = vmatpush1.bf16.msra.mxu1 %v1994_v59  ;;  %1034 = vmatprep.subr.bf16.mxu0 %v2016_v62  ;;  %v2076_v59 = vld [vmem:[#allocation7 + $0x300] ss:$16 sps:$4 sm:$0xff]   ;;  %v2087_v62 = vld [vmem:[#allocation7 + $0x32c] ss:$16 sps:$4 sm:$0xff]  }
  0x93   :  { %1110 = vmatprep.subr.bf16.mxu1 %v2002_v60  ;;  %v2079_v60 = vld [vmem:[#allocation7 + $0x308] ss:$16 sps:$4 sm:$0xff]  }
  0x95   :  { %1035 = vmatpush1.bf16.msra.mxu0 %v2021_v1  ;;  %v2090_v1 = vld [vmem:[#allocation7 + $0x344] ss:$16 sps:$4 sm:$0xff]  }
  0x96   :  { %1111 = vmatpush1.bf16.msra.mxu1 %v2000_v63  ;;  %1036 = vmatprep.subr.bf16.mxu0 %v2022_v7  ;;  %v2082_v63 = vld [vmem:[#allocation7 + $0x320] ss:$16 sps:$4 sm:$0xff]  }
  0x97   :  { %1112 = vmatprep.subr.bf16.mxu1 %v2008_v0  ;;  %v2085_v0 = vld [vmem:[#allocation7 + $0x328] ss:$16 sps:$4 sm:$0xff]   ;;  %v2094_v7 = vld [vmem:[#allocation7 + $0x360] ss:$16 sps:$4 sm:$0xff]  }
  0x99   :  { %1037 = vmatpush1.bf16.msra.mxu0 %v2027_v10  ;;  %v2105_v10 = vld [vmem:[#allocation7 + $0x38c] ss:$16 sps:$4 sm:$0xff]  }
  0x9a   :  { %1113 = vmatpush1.bf16.msra.mxu1 %v2006_v2  ;;  %1047 = vmatprep.subr.bf16.mxu0 %v2030_v11  ;;  %v2093_v2 = vld [vmem:[#allocation7 + $0x34c] ss:$16 sps:$4 sm:$0xff]   ;;  %v2100_v11 = vld [vmem:[#allocation7 + $0x380] ss:$16 sps:$4 sm:$0xff]  }
  0x9b   :  { %1114 = vmatprep.subr.bf16.mxu1 %v2014_v3  ;;  %v2088_v3 = vld [vmem:[#allocation7 + $0x340] ss:$16 sps:$4 sm:$0xff]  }
  0x9e   :  { %1115 = vmatpush1.bf16.msra.mxu1 %v2012_v4  ;;  %v2091_v4 = vld [vmem:[#allocation7 + $0x348] ss:$16 sps:$4 sm:$0xff]  }
  0x9f   :  { %1116 = vmatprep.subr.bf16.mxu1 %v2020_v5  ;;  %v2096_v5 = vld [vmem:[#allocation7 + $0x364] ss:$16 sps:$4 sm:$0xff]  }
  0xa2   :  { %1117 = vmatpush1.bf16.msra.mxu1 %v2018_v6  ;;  %v2099_v6 = vld [vmem:[#allocation7 + $0x36c] ss:$16 sps:$4 sm:$0xff]  }
  0xa3   :  { %1118 = vmatprep.subr.bf16.mxu1 %v2026_v8  ;;  %v2097_v8 = vld [vmem:[#allocation7 + $0x368] ss:$16 sps:$4 sm:$0xff]  }
  0xa6   :  { %1119 = vmatpush1.bf16.msra.mxu1 %v2024_v9  ;;  %v2102_v9 = vld [vmem:[#allocation7 + $0x384] ss:$16 sps:$4 sm:$0xff]  }
  0xa7   :  { %1129 = vmatprep.subr.bf16.mxu1 %v2033_v12  ;;  %v2103_v12 = vld [vmem:[#allocation7 + $0x388] ss:$16 sps:$4 sm:$0xff]  }
 0x134   :  { %v160_v13 = vpop.f32.mrb[0].mxu1 }
 0x135   :  { %v208_v14 = vmax.f32 %v160_v13, 0.0  ;;  %v162_v15 = vpop.f32.mrb[1].mxu1  ;;  %v2108_v13 = vld [vmem:[#allocation7 + $0x3a4] ss:$16 sps:$4 sm:$0xff]  }
 0x136   :  { %v209_v16 = vmax.f32 %v162_v15, 0.0  ;;  %v164_v17 = vpop.f32.mrb[2].mxu1  ;;  %v2106_v15 = vld [vmem:[#allocation7 + $0x3a0] ss:$16 sps:$4 sm:$0xff]  }
 0x137   :  { %v165_v18 = vpop.f32.mrb[3].mxu1  ;;  %v212_v22 = vpack.c.bf16 %v208_v14, %v208_v14  ;;  %v2111_v14 = vld [vmem:[#allocation7 + $0x3ac] ss:$16 sps:$4 sm:$0xff]   ;;  %v2114_v17 = vld [vmem:[#allocation7 + $0x3c4] ss:$16 sps:$4 sm:$0xff]  }
 0x138   :  { %v213_v19 = vpack.c.bf16 %v209_v16, %v209_v16  ;;  %v2109_v16 = vld [vmem:[#allocation7 + $0x3a8] ss:$16 sps:$4 sm:$0xff]   ;;  %v2117_v18 = vld [vmem:[#allocation7 + $0x3cc] ss:$16 sps:$4 sm:$0xff]  }
 0x13a   :  { %1038 = vmatprep.mubr.bf16.mxu0 %v213_v19  ;;  %1120 = vmatprep.mubr.bf16.mxu1 %v213_v19  ;;  %v2112_v19 = vld [vmem:[#allocation7 + $0x3c0] ss:$16 sps:$4 sm:$0xff]  }
 0x13b   :  { %1039 = vmatmul.mubr.bf16.vlgmr.msra.gmra.mrb[0].mxu0 %v212_v22  ;;  %1121 = vmatmul.mubr.bf16.vlgmr.msra.gmra.mrb[8].mxu1 %v212_v22  ;;  %v2123_v22 = vld [vmem:[#allocation7 + $0x3ec] ss:$16 sps:$4 sm:$0xff]  }
 0x13c   :  { %1048 = vmatpush1.bf16.msra.mxu0 %v2028_v20  ;;  %1130 = vmatpush1.bf16.msra.mxu1 %v2031_v21  ;;  %v2448_v27 = vpop.f32.mrb[4].mxu1  ;;  %v2115_v20 = vld [vmem:[#allocation7 + $0x3c8] ss:$16 sps:$4 sm:$0xff]   ;;  %v2120_v21 = vld [vmem:[#allocation7 + $0x3e4] ss:$16 sps:$4 sm:$0xff]  }
 0x13d   :  { %1049 = vmatprep.subr.bf16.mxu0 %v2036_v23  ;;  %1131 = vmatprep.subr.bf16.mxu1 %v2039_v24  ;;  %v203_v30 = vpop.f32.mrb[5].mxu1  ;;  %v2118_v23 = vld [vmem:[#allocation7 + $0x3e0] ss:$16 sps:$4 sm:$0xff]   ;;  %v2121_v24 = vld [vmem:[#allocation7 + $0x3e8] ss:$16 sps:$4 sm:$0xff]  }
 0x13e   :  { %v211_v31 = vmax.f32 %v203_v30, 0.0  ;;  %v205_v32 = vpop.f32.mrb[6].mxu1  ;;  %v2127_v30 = vld [vmem:[#allocation8 + $0x80] sm:$0xff]  }
 0x13f   :  { %v206_v33 = vpop.f32.mrb[7].mxu1  ;;  %v2128_v32 = vld [vmem:[#allocation8 + $0x48] sm:$0xff]  }
 0x140   :  { %1050 = vmatpush1.bf16.msra.mxu0 %v2034_v25  ;;  %1132 = vmatpush1.bf16.msra.mxu1 %v2037_v26  ;;  %v215_v36 = vpack.c.bf16 %v211_v31, %v211_v31  ;;  %v210_v25 = vmax.f32 %v2448_v27, 0.0  ;;  %v2124_v26 = vld [vmem:[#allocation8 + $0x40] sm:$0xff]   ;;  %v2129_v33 = vld [vmem:[#allocation8 + $0xc8] sm:$0xff]   ;;  %v2132_v27 = vld [vmem:[#allocation8 + $0x50] sm:$0xff]  }
 0x141   :  { %1051 = vmatprep.subr.bf16.mxu0 %v2042_v28  ;;  %1133 = vmatprep.subr.bf16.mxu1 %v2045_v29  ;;  %v2125_v28 = vld [vmem:[#allocation8 + $0xc0] sm:$0xff]  }
 0x142   :  { %1079 = vmatprep.mubr.bf16.mxu0 %v215_v36  ;;  %1161 = vmatprep.mubr.bf16.mxu1 %v215_v36  ;;  %v2126_v29 = vld [vmem:[#allocation8] sm:$0xff]   ;;  %v214_v31 = vpack.c.bf16 %v210_v25, %v210_v25  ;;  %v2133_v36 = vld [vmem:[#allocation8 + $0xd0] sm:$0xff]  }
 0x143   :  { %v2156_v25 = vld [vmem:[#allocation10] sm:$0xff]  }
 0x144   :  { %1052 = vmatpush1.bf16.msra.mxu0 %v2040_v34  ;;  %1134 = vmatpush1.bf16.msra.mxu1 %v2043_v35  ;;  %v2130_v34 = vld [vmem:[#allocation8 + $0x8] sm:$0xff]  }
 0x145   :  { %1053 = vmatprep.subr.bf16.mxu0 %v2048_v37  ;;  %1135 = vmatprep.subr.bf16.mxu1 %v2051_v38  ;;  %v2131_v35 = vld [vmem:[#allocation8 + $0x88] sm:$0xff]   ;;  %v2134_v37 = vld [vmem:[#allocation8 + $0x10] sm:$0xff]  }
 0x146   :  { %v2135_v38 = vld [vmem:[#allocation8 + $0x90] sm:$0xff]  }
 0x148   :  { %1054 = vmatpush1.bf16.msra.mxu0 %v2046_v39  ;;  %1136 = vmatpush1.bf16.msra.mxu1 %v2049_v40  ;;  %v2136_v39 = vld [vmem:[#allocation8 + $0x58] sm:$0xff]  }
 0x149   :  { %1055 = vmatprep.subr.bf16.mxu0 %v2054_v41  ;;  %1137 = vmatprep.subr.bf16.mxu1 %v2057_v42  ;;  %v2137_v40 = vld [vmem:[#allocation8 + $0xd8] sm:$0xff]  }
 0x14a   :  { %v2138_v41 = vld [vmem:[#allocation8 + $0x18] sm:$0xff]  }
 0x14b   :  { %v2139_v42 = vld [vmem:[#allocation8 + $0x98] sm:$0xff]  }
 0x14c   :  { %1056 = vmatpush1.bf16.msra.mxu0 %v2052_v43  ;;  %1138 = vmatpush1.bf16.msra.mxu1 %v2055_v44  ;;  %v2140_v43 = vld [vmem:[#allocation8 + $0x60] sm:$0xff]  }
 0x14d   :  { %1057 = vmatprep.subr.bf16.mxu0 %v2060_v45  ;;  %1139 = vmatprep.subr.bf16.mxu1 %v2063_v46  ;;  %v2141_v44 = vld [vmem:[#allocation8 + $0xe0] sm:$0xff]  }
 0x14e   :  { %v2142_v45 = vld [vmem:[#allocation8 + $0x20] sm:$0xff]  }
 0x14f   :  { %v2143_v46 = vld [vmem:[#allocation8 + $0xa0] sm:$0xff]  }
 0x150   :  { %1058 = vmatpush1.bf16.msra.mxu0 %v2058_v47  ;;  %1140 = vmatpush1.bf16.msra.mxu1 %v2061_v48  ;;  %v2144_v47 = vld [vmem:[#allocation8 + $0x68] sm:$0xff]  }
 0x151   :  { %1059 = vmatprep.subr.bf16.mxu0 %v2066_v49  ;;  %1141 = vmatprep.subr.bf16.mxu1 %v2069_v50  ;;  %v2145_v48 = vld [vmem:[#allocation8 + $0xe8] sm:$0xff]  }
 0x152   :  { %v2146_v49 = vld [vmem:[#allocation8 + $0x28] sm:$0xff]  }
 0x153   :  { %v2147_v50 = vld [vmem:[#allocation8 + $0xa8] sm:$0xff]  }
 0x154   :  { %1060 = vmatpush1.bf16.msra.mxu0 %v2064_v51  ;;  %1142 = vmatpush1.bf16.msra.mxu1 %v2067_v52  ;;  %v2148_v51 = vld [vmem:[#allocation8 + $0x70] sm:$0xff]  }
 0x155   :  { %1061 = vmatprep.subr.bf16.mxu0 %v2072_v53  ;;  %1143 = vmatprep.subr.bf16.mxu1 %v2075_v54  ;;  %v2149_v52 = vld [vmem:[#allocation8 + $0xf0] sm:$0xff]  }
 0x156   :  { %v2150_v53 = vld [vmem:[#allocation8 + $0x30] sm:$0xff]  }
 0x157   :  { %v2151_v54 = vld [vmem:[#allocation8 + $0xb0] sm:$0xff]  }
 0x158   :  { %1062 = vmatpush1.bf16.msra.mxu0 %v2070_v55  ;;  %1144 = vmatpush1.bf16.msra.mxu1 %v2073_v56  ;;  %v2152_v55 = vld [vmem:[#allocation8 + $0x78] sm:$0xff]  }
 0x159   :  { %1063 = vmatprep.subr.bf16.mxu0 %v2078_v57  ;;  %1145 = vmatprep.subr.bf16.mxu1 %v2081_v58  ;;  %v2153_v56 = vld [vmem:[#allocation8 + $0xf8] sm:$0xff]  }
 0x15a   :  { %v2154_v57 = vld [vmem:[#allocation8 + $0x38] sm:$0xff]  }
 0x15b   :  { %v2155_v58 = vld [vmem:[#allocation8 + $0xb8] sm:$0xff]  }
 0x15c   :  { %1064 = vmatpush1.bf16.msra.mxu0 %v2076_v59  ;;  %1146 = vmatpush1.bf16.msra.mxu1 %v2079_v60  ;;  %v2314_v59 = vmov 0.0   ;;  %v346_v60 = vlaneseq }
 0x15d   :  { %1065 = vmatprep.subr.bf16.mxu0 %v2084_v61  ;;  %1147 = vmatprep.subr.bf16.mxu1 %v2087_v62 }
 0x15e   :  { %v347_v61 = vshrl.u32 %v346_v60, 7 }
 0x160   :  { %1066 = vmatpush1.bf16.msra.mxu0 %v2082_v63  ;;  %1148 = vmatpush1.bf16.msra.mxu1 %v2085_v0  ;;  %v348_v62 = vsub.s32 0, %v347_v61  ;;  %v356_v63 = vsub.s32 2, %v347_v61  ;;  %v344_v0 = vld [vmem:[%s2475_s3] sm:$0xf] }
 0x161   :  { %1067 = vmatprep.subr.bf16.mxu0 %v2090_v1  ;;  %1149 = vmatprep.subr.bf16.mxu1 %v2093_v2  ;;  %v352_v1 = vsub.s32 1, %v347_v61  ;;  %v360_v2 = vsub.s32 3, %v347_v61 }
 0x164   :  { %1068 = vmatpush1.bf16.msra.mxu0 %v2088_v3  ;;  %1150 = vmatpush1.bf16.msra.mxu1 %v2091_v4  ;;  %v349_v3 = vrot.slane %v344_v0, %v348_v62  ;;  %v357_v4 = vrot.slane %v344_v0, %v356_v63 }
 0x165   :  { %1069 = vmatprep.subr.bf16.mxu0 %v2096_v5  ;;  %1151 = vmatprep.subr.bf16.mxu1 %v2099_v6  ;;  %v353_v5 = vrot.slane %v344_v0, %v352_v1  ;;  %v361_v6 = vrot.slane %v344_v0, %v360_v2 }
 0x168   :  { %1070 = vmatpush1.bf16.msra.mxu0 %v2094_v7  ;;  %1152 = vmatpush1.bf16.msra.mxu1 %v2097_v8 }
 0x169   :  { %1071 = vmatprep.subr.bf16.mxu0 %v2102_v9  ;;  %1153 = vmatprep.subr.bf16.mxu1 %v2105_v10 }
 0x16c   :  { %1072 = vmatpush1.bf16.msra.mxu0 %v2100_v11  ;;  %1154 = vmatpush1.bf16.msra.mxu1 %v2103_v12 }
 0x16d   :  { %1073 = vmatprep.subr.bf16.mxu0 %v2108_v13  ;;  %1155 = vmatprep.subr.bf16.mxu1 %v2111_v14 }
 0x170   :  { %1074 = vmatpush1.bf16.msra.mxu0 %v2106_v15  ;;  %1156 = vmatpush1.bf16.msra.mxu1 %v2109_v16 }
 0x171   :  { %1075 = vmatprep.subr.bf16.mxu0 %v2114_v17  ;;  %1157 = vmatprep.subr.bf16.mxu1 %v2117_v18 }
 0x174   :  { %1076 = vmatpush1.bf16.msra.mxu0 %v2112_v19  ;;  %1158 = vmatpush1.bf16.msra.mxu1 %v2115_v20 }
 0x175   :  { %1077 = vmatprep.subr.bf16.mxu0 %v2120_v21  ;;  %1159 = vmatprep.subr.bf16.mxu1 %v2123_v22 }
 0x178   :  { %1078 = vmatpush1.bf16.msra.mxu0 %v2118_v23  ;;  %1160 = vmatpush1.bf16.msra.mxu1 %v2121_v24 }
 0x179   :  { %1830 = vmatprep.subr.bf16.mxu0 %v2124_v26  ;;  %1852 = vmatprep.subr.bf16.mxu1 %v2125_v28 }
 0x17b   :  { %1080 = vmatmul.mubr.bf16.vlgmr.msra.gmra.mrb[0].mxu0 %v214_v31  ;;  %1162 = vmatmul.mubr.bf16.vlgmr.msra.gmra.mrb[8].mxu1 %v214_v31  ;;  %v2159_v31 = vld [vmem:[#allocation10 + $0x18] sm:$0xff]  }
 0x17c   :  { %1831 = vmatpush3.bf16.msra.mxu0 %v2126_v29  ;;  %1853 = vmatpush3.bf16.msra.mxu1 %v2127_v30  ;;  %v2157_v29 = vld [vmem:[#allocation10 + $0x8] sm:$0xff]   ;;  %v2158_v30 = vld [vmem:[#allocation10 + $0x10] sm:$0xff]  }
 0x17d   :  { %1832 = vmatprep.subr.bf16.mxu0 %v2128_v32  ;;  %1854 = vmatprep.subr.bf16.mxu1 %v2129_v33  ;;  %v2160_v32 = vld [vmem:[#allocation10 + $0x20] sm:$0xff]   ;;  %v2161_v33 = vld [vmem:[#allocation10 + $0x28] sm:$0xff]  }
 0x180   :  { %1833 = vmatpush3.bf16.msra.mxu0 %v2130_v34  ;;  %1855 = vmatpush3.bf16.msra.mxu1 %v2131_v35  ;;  %v2162_v34 = vld [vmem:[#allocation10 + $0x30] sm:$0xff]   ;;  %v2163_v35 = vld [vmem:[#allocation10 + $0x38] sm:$0xff]  }
 0x181   :  { %1834 = vmatprep.subr.bf16.mxu0 %v2132_v27  ;;  %1856 = vmatprep.subr.bf16.mxu1 %v2133_v36 }
 0x184   :  { %1835 = vmatpush3.bf16.msra.mxu0 %v2134_v37  ;;  %1857 = vmatpush3.bf16.msra.mxu1 %v2135_v38  ;;  %v1788_v37 = vld [vmem:[%s2477_s5] ss:$0 sm:$0xff]  ;;  %s2274_s5 = scalar_lea.vmem %s1642_s24, 128 }
 0x185   :  { %1836 = vmatprep.subr.bf16.mxu0 %v2136_v39  ;;  %1858 = vmatprep.subr.bf16.mxu1 %v2137_v40  ;;  %p2275_p12 = scmp.ne.s32.totalorder %s1642_s24, %s2274_s5  ;;  %p2280_p0 = scmp.lt.s32.totalorder %s2274_s5, %s2274_s5 }
 0x187   :  { %p2281_p1 = por %p2280_p0, %p2279_p13 }
 0x188   :  { %1837 = vmatpush3.bf16.msra.mxu0 %v2138_v41  ;;  %1859 = vmatpush3.bf16.msra.mxu1 %v2139_v42 }
 0x189   :  { %1838 = vmatprep.subr.bf16.mxu0 %v2140_v43  ;;  %1860 = vmatprep.subr.bf16.mxu1 %v2141_v44  ;;  %p2282_p2 = pnand %p2281_p1, %p2275_p12 }
 0x18c   :  { %1839 = vmatpush3.bf16.msra.mxu0 %v2142_v45  ;;  %1861 = vmatpush3.bf16.msra.mxu1 %v2143_v46 }
 0x18d   :  { %1840 = vmatprep.subr.bf16.mxu0 %v2144_v47  ;;  %1862 = vmatprep.subr.bf16.mxu1 %v2145_v48 }
 0x190   :  { %1841 = vmatpush3.bf16.msra.mxu0 %v2146_v49  ;;  %1863 = vmatpush3.bf16.msra.mxu1 %v2147_v50  ;;  %v1821_v50 = vld [vmem:[%s2479_s7] ss:$0 sm:$0xff] }
 0x191   :  { %1842 = vmatprep.subr.bf16.mxu0 %v2148_v51  ;;  %1864 = vmatprep.subr.bf16.mxu1 %v2149_v52 }
 0x194   :  { %1843 = vmatpush3.bf16.msra.mxu0 %v2150_v53  ;;  %1865 = vmatpush3.bf16.msra.mxu1 %v2151_v54 }
 0x195   :  { %1844 = vmatprep.subr.bf16.mxu0 %v2152_v55  ;;  %1866 = vmatprep.subr.bf16.mxu1 %v2153_v56 }
 0x198   :  { %1845 = vmatpush3.bf16.msra.mxu0 %v2154_v57  ;;  %1867 = vmatpush3.bf16.msra.mxu1 %v2155_v58 }
 0x199   :  { %1883 = vmatprep.subr.bf16.mxu0 %v2314_v59 }
 0x24e   :  { %v1081_v7 = vpop.f32.mrb[0].mxu0  ;;  %v1163_v8 = vpop.f32.mrb[8].mxu1 }
 0x24f   :  { %v1903_v9 = vadd.f32 %v1081_v7, %v349_v3  ;;  %v1905_v10 = vadd.f32 %v1163_v8, %v357_v4  ;;  %v1083_v11 = vpop.f32.mrb[1].mxu0  ;;  %v1165_v12 = vpop.f32.mrb[9].mxu1 }
 0x250   :  { %v1904_v13 = vadd.f32 %v1083_v11, %v353_v5  ;;  %v1906_v14 = vadd.f32 %v1165_v12, %v361_v6  ;;  %v1085_v15 = vpop.f32.mrb[2].mxu0  ;;  %v1167_v16 = vpop.f32.mrb[10].mxu1 }
 0x251   :  { %v1170_v17 = vmax.f32 %v1903_v9, 0.0  ;;  %v1172_v18 = vmax.f32 %v1905_v10, 0.0  ;;  %v1086_v19 = vpop.f32.mrb[3].mxu0  ;;  %v1168_v20 = vpop.f32.mrb[11].mxu1 }
 0x252   :  { %v1171_v21 = vmax.f32 %v1904_v13, 0.0  ;;  %v1173_v22 = vmax.f32 %v1906_v14, 0.0 }
 0x253   :  { %v1174_v26 = vpack.c.bf16 %v1170_v17, %v1170_v17  ;;  %v1176_v28 = vpack.c.bf16 %v1172_v18, %v1172_v18 }
 0x254   :  { %v1175_v23 = vpack.c.bf16 %v1171_v21, %v1171_v21  ;;  %v1177_v24 = vpack.c.bf16 %v1173_v22, %v1173_v22 }
 0x256   :  { %1473 = vmatprep.mubr.bf16.mxu0 %v1175_v23  ;;  %1513 = vmatprep.mubr.bf16.mxu1 %v1177_v24 }
 0x257   :  { %1474 = vmatmul.mubr.bf16.vlgmr.msra.gmra.mrb[4].mxu0 %v1174_v26  ;;  %1514 = vmatmul.mubr.bf16.vlgmr.msra.gmra.mrb[12].mxu1 %v1176_v28 }
 0x258   :  { %1884 = vmatpush3.bf16.msra.mxu0 %v2156_v25  ;;  %1899 = vmatprep.mubr.msk.bf16.mxu0 %vm2315_vm2, %v2314_v59 }
 0x259   :  { %1885 = vmatprep.subr.bf16.mxu0 %v2314_v59 }
 0x25c   :  { %1886 = vmatpush3.bf16.msra.mxu0 %v2157_v29 }
 0x25d   :  { %1887 = vmatprep.subr.bf16.mxu0 %v2314_v59 }
 0x260   :  { %1888 = vmatpush3.bf16.msra.mxu0 %v2158_v30 }
 0x261   :  { %1889 = vmatprep.subr.bf16.mxu0 %v2314_v59 }
 0x264   :  { %1890 = vmatpush3.bf16.msra.mxu0 %v2159_v31 }
 0x265   :  { %1891 = vmatprep.subr.bf16.mxu0 %v2314_v59 }
 0x268   :  { %1892 = vmatpush3.bf16.msra.mxu0 %v2160_v32 }
 0x269   :  { %1893 = vmatprep.subr.bf16.mxu0 %v2314_v59 }
 0x26c   :  { %1894 = vmatpush3.bf16.msra.mxu0 %v2161_v33 }
 0x26d   :  { %1895 = vmatprep.subr.bf16.mxu0 %v2314_v59 }
 0x270   :  { %1896 = vmatpush3.bf16.msra.mxu0 %v2162_v34 }
 0x271   :  { %1897 = vmatprep.subr.bf16.mxu0 %v2314_v59 }
 0x274   :  { %1898 = vmatpush3.bf16.msra.mxu0 %v2163_v35 }
 0x32a   :  { %v1846_v27 = vpop.f32.mrb[4].mxu0  ;;  %v1868_v36 = vpop.f32.mrb[12].mxu1 }
 0x32b   :  { %v1847_v38 = vpop.f32.mrb[5].mxu0  ;;  %v1869_v39 = vpop.f32.mrb[13].mxu1 }
 0x32c   :  { %v1848_v40 = vadd.f32 %v1847_v38, %v1846_v27  ;;  %v1870_v41 = vadd.f32 %v1869_v39, %v1868_v36  ;;  %v1849_v42 = vpop.f32.mrb[6].mxu0  ;;  %v1871_v43 = vpop.f32.mrb[14].mxu1 }
 0x32d   :  { %v1850_v44 = vpop.f32.mrb[7].mxu0  ;;  %v1872_v45 = vpop.f32.mrb[15].mxu1 }
 0x32e   :  { %v1476_v46 = vadd.f32 %v1848_v40, %v1788_v37 }
 0x330   :  { %v1516_v47 = vadd.f32 %v1870_v41, %v1476_v46 }
 0x332   :  { %v1521_v48 = vmax.f32 %v1516_v47, 0.0 }
 0x334   :  { %v1522_v49 = vpack.c.bf16 %v1521_v48, %v1521_v48 }
 0x336   :  { %1900 = vmatmul.mubr.bf16.vlgmr.msra.gmra.mrb[8].mxu0 %v1522_v49 }
 0x409   :  { %v1628_v51 = vpop.f32.mrb[8].mxu0 }
 0x40a   :  { %v1629_v52 = vadd.f32 %v1821_v50, %v1628_v51  ;;  %v1901_v53 = vpop.f32.mrb[9].mxu0 }
 0x40b   :  { %v1631_v54 = vpop.f32.mrb[10].mxu0 }
 0x40c   :  { %1634 = vst [vmem:[#allocation11] sm:$0xff] %v1629_v52  ;;  %v1902_v55 = vpop.f32.mrb[11].mxu0 }
 0x40d   :  { %2285 = shalt.err (!%p2282_p2)
}
 0x40e   :  { %s2286_s7 = scalar_lea.hbm %s2480_s8, 128 }
 0x40f   :  { %p2287_p3 = scmp.ne.s32.totalorder %s2480_s8, %s2286_s7  ;;  %p2290_p4 = scmp.lt.u32.totalorder %s2286_s7, %s2480_s8 }
 0x411   :  { %p2292_p5 = pnand %p2290_p4, %p2287_p3 }
 0x413   :  { %2295 = shalt.err (!%p2292_p5)
}
 0x414   :  { %1644 = dma.vmem_to_hbm [thread:$0]  %s1642_s24, 128, %s2480_s8, [#allocation4]  }
 0x415   :  { %2302 = dma.done.wait [#allocation4], 128  }
 0x416   :  { %2303 = vsyncadd [#allocation4], 4294967168 }
 0x417   :  { %1648 = vsyncpa [#allocation3], 1 }
 0x418   :  { %1649 = vsyncpa [#allocation6], 1 }
 0x419   :  { %1650 = vsyncpa [#allocation9], 1 }
 0x41a   :  { %1651 = vsyncpa [#allocation4], 1 }

</bundles_post_ra>
